<compile_context>
chip_gen: v5e
topology: v5e:2x2
jax: 0.10.0
libtpu: 0.0.40
codegen_flags: <defaults>
</compile_context>

<pallas_src>
import numpy as np
import jax
import jax.numpy as jnp
from jax import lax
from jax.experimental import pallas as pl
from jax.experimental.pallas import tpu as pltpu


# ------------------------------------------------------------------ kernel

def fused_net_kernel(xg_ref, wb1_ref, b1_ref, wb2_ref, b2_ref, wf_ref, bf_ref,
                     o_ref, y1_scr):
    """Full forward pass for one batch tile of TB examples.

    xg_ref : (1, 12*TB, 168)  row (a*6+ih)*TB + n holds image rows
             4*ih + 2*a + s (s=0..5) concatenated: col s*28 + v = x[4ih+2a+s, v]
    wb1_ref: (4, 168, 120)    banded conv1 weights, one band per pooling phase
             p = 2*qh + qw; col = j*10 + c
    b1_ref : (1, 120)         conv1 bias tiled over j
    wb2_ref: (10, 120, 80)    banded conv2 weights, index qw2*5 + di;
             row = j*10 + ci, col = j2*20 + co
    b2_ref : (1, 80)          conv2 bias tiled over j2
    wf_ref : (4, 80, 128)     fc weights per i2, output lanes padded 10 -> 128
    bf_ref : (1, 128)
    o_ref  : (TB, 128)        logits in lanes 0..9, rest zero
    y1_scr : (12*TB, 120)     pooled conv1 activations, row (a*6+ih)*TB + n
             holds pooled row i = 2*ih + a, col j*10 + c
    """
    tb = o_ref.shape[0]
    xg = xg_ref[0]                                            # (12*TB, 168)

    # ---- conv1 + maxpool(2) + relu: 4 banded MXU matmuls, max over phases --
    c1 = jnp.dot(xg, wb1_ref[0], preferred_element_type=jnp.float32)
    for p in range(1, 4):
        c1 = jnp.maximum(
            c1, jnp.dot(xg, wb1_ref[p], preferred_element_type=jnp.float32))
    # bias after the pooling max (max(conv)+b == max(conv+b)), fused with relu
    y1_scr[...] = jnp.maximum(c1 + b1_ref[...], 0.0)          # (12*TB, 120)

    # ---- conv2 + maxpool(2) + relu ----------------------------------------
    c2 = None
    for qh2 in range(2):                   # pooling phases (running max)
        for qw2 in range(2):
            acc = None
            for di in range(5):            # kernel rows (accumulate)
                s = qh2 + di
                up, sh = s & 1, s >> 1
                base = (up * 6 + sh) * tb
                lhs = y1_scr[base:base + 4 * tb, :]           # (4*TB, 120)
                r = jnp.dot(lhs, wb2_ref[qw2 * 5 + di],
                            preferred_element_type=jnp.float32)   # (4*TB, 80)
                acc = r if acc is None else acc + r
            c2 = acc if c2 is None else jnp.maximum(c2, acc)
    y2 = jnp.maximum(c2 + b2_ref[...], 0.0)   # (4*TB, 80), row = i2*TB + n

    # ---- flatten (PyTorch C,H,W order via weight layout) + fc --------------
    out = jnp.dot(y2[0:tb, :], wf_ref[0], preferred_element_type=jnp.float32)
    for i2 in range(1, 4):
        out = out + jnp.dot(y2[i2 * tb:(i2 + 1) * tb, :], wf_ref[i2],
                            preferred_element_type=jnp.float32)
    o_ref[...] = out + bf_ref[...]                            # (TB, 128) dense


# ------------------------------------------------------------------ wrapper

def _round_up(x, m):
    return (x + m - 1) // m * m


def _pick_batch_tile(n):
    """Batch tile: multiple of 8 sublanes, <=128; prefer >=2 grid steps (v7x)."""
    npad8 = _round_up(max(n, 1), 8)
    tb = min(128, npad8)
    if tb > 8 and npad8 // tb < 2:
        tb = _round_up(tb // 2, 8)
    return tb


# static (trace-time) gather indices: ROW[a, ih, s] = 4*ih + 2*a + s
_ROW_GATHER = (2 * np.arange(2)[:, None, None]
               + 4 * np.arange(6)[None, :, None]
               + np.arange(6)[None, None, :])                 # (2, 6, 6)


def _conv1_bands(w1):
    """w1 (10,1,5,5) -> (4,168,120) banded matrices, one per pooling phase."""
    r = np.arange(168)
    c = np.arange(120)
    S = (r // 28)[:, None]
    V = (r % 28)[:, None]
    J = (c // 10)[None, :]
    C = (c % 10)[None, :]
    bands = []
    for qh in range(2):
        for qw in range(2):
            DI = S - qh                      # kernel row
            DJ = V - 2 * J - qw              # kernel col
            m = (DI >= 0) & (DI < 5) & (DJ >= 0) & (DJ < 5)
            vals = w1[C, 0, np.clip(DI, 0, 4), np.clip(DJ, 0, 4)]
            bands.append(jnp.where(jnp.asarray(m), vals, 0.0))
    return jnp.stack(bands, 0)


def _conv2_bands(w2):
    """w2 (20,10,5,5) -> (10,120,80) banded matrices, index = qw2*5 + di."""
    r = np.arange(120)
    c = np.arange(80)
    J = (r // 10)[:, None]
    CI = (r % 10)[:, None]
    J2 = (c // 20)[None, :]
    CO = (c % 20)[None, :]
    bands = []
    for qw2 in range(2):
        for di in range(5):
            DJ = J - 2 * J2 - qw2
            m = (DJ >= 0) & (DJ < 5)
            vals = w2[CO, CI, di, np.clip(DJ, 0, 4)]
            bands.append(jnp.where(jnp.asarray(m), vals, 0.0))
    return jnp.stack(bands, 0)


def _fc_weights(wf, bf):
    """wf (10,320) with feature index co*16+i2*4+j2 -> (4,80,128); pad lanes."""
    wfr = wf.reshape(10, 20, 4, 4)                              # [k, co, i2, j2]
    wfc = jnp.transpose(wfr, (2, 3, 1, 0)).reshape(4, 80, 10)   # [i2, j2*20+co, k]
    wfc = jnp.pad(wfc, ((0, 0), (0, 0), (0, 118)))              # k: 10 -> 128
    bfp = jnp.pad(bf, (0, 118)).reshape(1, 128)
    return wfc, bfp


def net_forward(x_nchw, params):
    w1, b1, w2, b2, wf, bf = params
    n = x_nchw.shape[0]
    tb = _pick_batch_tile(n)
    n_pad = _round_up(max(n, 1), tb)
    n_tiles = n_pad // tb

    # Input re-layout: per batch tile, rows (a*6+ih)*tb + n_local, 168 lanes.
    xs = x_nchw.reshape(n, 28, 28).astype(jnp.float32)
    xs = jnp.pad(xs, ((0, n_pad - n), (0, 0), (0, 0)))
    xg = xs[:, _ROW_GATHER, :]                       # (n_pad, 2, 6, 6, 28)
    xg = xg.reshape(n_pad, 12, 168)
    xg = xg.reshape(n_tiles, tb, 12, 168)
    xg = jnp.transpose(xg, (0, 2, 1, 3)).reshape(n_tiles, 12 * tb, 168)

    # Weight re-layouts (one-time; convs become plain MXU matmuls).
    wb1 = _conv1_bands(w1.astype(jnp.float32))       # (4, 168, 120)
    wb2 = _conv2_bands(w2.astype(jnp.float32))       # (10, 120, 80)
    wfc, bfp = _fc_weights(wf.astype(jnp.float32), bf.astype(jnp.float32))
    b1t = jnp.tile(b1.astype(jnp.float32), 12).reshape(1, 120)
    b2t = jnp.tile(b2.astype(jnp.float32), 4).reshape(1, 80)

    out = pl.pallas_call(
        fused_net_kernel,
        out_shape=jax.ShapeDtypeStruct((n_pad, 128), jnp.float32),
        grid=(n_tiles,),
        in_specs=[
            pl.BlockSpec((1, 12 * tb, 168), lambda t: (t, 0, 0)),
            pl.BlockSpec((4, 168, 120), lambda t: (0, 0, 0)),
            pl.BlockSpec((1, 120), lambda t: (0, 0)),
            pl.BlockSpec((10, 120, 80), lambda t: (0, 0, 0)),
            pl.BlockSpec((1, 80), lambda t: (0, 0)),
            pl.BlockSpec((4, 80, 128), lambda t: (0, 0, 0)),
            pl.BlockSpec((1, 128), lambda t: (0, 0)),
        ],
        out_specs=pl.BlockSpec((tb, 128), lambda t: (t, 0)),
        scratch_shapes=[pltpu.VMEM((12 * tb, 120), jnp.float32)],
        compiler_params=pltpu.CompilerParams(
            dimension_semantics=("parallel",),
            vmem_limit_bytes=32 * 1024 * 1024),
    )(xg, wb1, b1t, wb2, b2t, wfc, bfp)
    return out[:n, :10]


# ------------------------------------------------------------------ reference

def reference_forward(x, params):
    w1, b1, w2, b2, wf, bf = params
    dn = ('NCHW', 'OIHW', 'NCHW')
    hp = lax.Precision.HIGHEST
    y = lax.conv_general_dilated(x, w1, (1, 1), 'VALID',
                                 dimension_numbers=dn, precision=hp)
    y = y + b1[None, :, None, None]
    y = lax.reduce_window(y, -jnp.inf, lax.max, (1, 1, 2, 2), (1, 1, 2, 2), 'VALID')
    y = jnp.maximum(y, 0.0)
    y = lax.conv_general_dilated(y, w2, (1, 1), 'VALID',
                                 dimension_numbers=dn, precision=hp)
    y = y + b2[None, :, None, None]
    y = lax.reduce_window(y, -jnp.inf, lax.max, (1, 1, 2, 2), (1, 1, 2, 2), 'VALID')
    y = jnp.maximum(y, 0.0)
    y = y.reshape(x.shape[0], -1)
    return jnp.dot(y, wf.T, precision=hp) + bf


if __name__ == "__main__":
    key = jax.random.PRNGKey(0)
    ks = jax.random.split(key, 8)
    w1 = jax.random.normal(ks[0], (10, 1, 5, 5), jnp.float32) * 0.2
    b1 = jax.random.normal(ks[1], (10,), jnp.float32) * 0.1
    w2 = jax.random.normal(ks[2], (20, 10, 5, 5), jnp.float32) * 0.1
    b2 = jax.random.normal(ks[3], (20,), jnp.float32) * 0.1
    wf = jax.random.normal(ks[4], (10, 320), jnp.float32) * 0.05
    bf = jax.random.normal(ks[5], (10,), jnp.float32) * 0.1
    params = (w1, b1, w2, b2, wf, bf)

    fwd = jax.jit(net_forward)

    # Small batch (single grid step).
    x = jax.random.normal(ks[6], (2, 1, 28, 28), jnp.float32)
    out = jax.block_until_ready(fwd(x, params))
    ref = jax.block_until_ready(reference_forward(x, params))
    assert out.shape == (2, 10)
    np.testing.assert_allclose(np.asarray(out), np.asarray(ref),
                               rtol=1e-3, atol=1e-3)

    # Larger batch exercising multiple batch tiles (grid > 1) + padding.
    x2 = jax.random.normal(ks[7], (24, 1, 28, 28), jnp.float32)
    out2 = jax.block_until_ready(fwd(x2, params))
    ref2 = jax.block_until_ready(reference_forward(x2, params))
    assert out2.shape == (24, 10)
    np.testing.assert_allclose(np.asarray(out2), np.asarray(ref2),
                               rtol=1e-3, atol=1e-3)

    print("KERNEL_OK")
</pallas_src>

<mosaic_0001>
module attributes {stable_mosaic.version = 11 : i64} {
  func.func @fused_net_kernel(%arg0: i32, %arg1: memref<1x96x168xf32, #tpu.memory_space<vmem>>, %arg2: memref<4x168x120xf32, #tpu.memory_space<vmem>>, %arg3: memref<1x120xf32, #tpu.memory_space<vmem>>, %arg4: memref<10x120x80xf32, #tpu.memory_space<vmem>>, %arg5: memref<1x80xf32, #tpu.memory_space<vmem>>, %arg6: memref<4x80x128xf32, #tpu.memory_space<vmem>>, %arg7: memref<1x128xf32, #tpu.memory_space<vmem>>, %arg8: memref<8x128xf32, #tpu.memory_space<vmem>>, %arg9: memref<96x120xf32, #tpu.memory_space<vmem>>) attributes {dimension_semantics = [#tpu.dimension_semantics<parallel>], iteration_bounds = array<i64: 1>, scalar_prefetch = 0 : i64, scratch_operands = 1 : i64, tpu.core_type = #tpu.core_type<tc>, window_params = [{transform_indices = @transform_0, window_bounds = array<i64: 1, 96, 168>}, {pipeline_mode = #tpu.pipeline_mode<synchronous>, transform_indices = @transform_1, window_bounds = array<i64: 4, 168, 120>}, {pipeline_mode = #tpu.pipeline_mode<synchronous>, transform_indices = @transform_2, window_bounds = array<i64: 1, 120>}, {pipeline_mode = #tpu.pipeline_mode<synchronous>, transform_indices = @transform_3, window_bounds = array<i64: 10, 120, 80>}, {pipeline_mode = #tpu.pipeline_mode<synchronous>, transform_indices = @transform_4, window_bounds = array<i64: 1, 80>}, {pipeline_mode = #tpu.pipeline_mode<synchronous>, transform_indices = @transform_5, window_bounds = array<i64: 4, 80, 128>}, {pipeline_mode = #tpu.pipeline_mode<synchronous>, transform_indices = @transform_6, window_bounds = array<i64: 1, 128>}, {transform_indices = @transform_7, window_bounds = array<i64: 8, 128>}]} {
    %c0 = arith.constant 0 : index
    %c0_0 = arith.constant 0 : index
    %c0_1 = arith.constant 0 : index
    %0 = vector.load %arg1[%c0, %c0_0, %c0_1] : memref<1x96x168xf32, #tpu.memory_space<vmem>>, vector<1x96x168xf32>
    %1 = vector.shape_cast %0 : vector<1x96x168xf32> to vector<96x168xf32>
    %c0_2 = arith.constant 0 : index
    %c0_3 = arith.constant 0 : index
    %c0_4 = arith.constant 0 : index
    %2 = vector.load %arg2[%c0_2, %c0_3, %c0_4] : memref<4x168x120xf32, #tpu.memory_space<vmem>>, vector<1x168x120xf32>
    %3 = vector.shape_cast %2 : vector<1x168x120xf32> to vector<168x120xf32>
    %cst = arith.constant dense<0.000000e+00> : vector<96x120xf32>
    %4 = tpu.matmul %1, %3, %cst {dimension_numbers = #tpu.dot_dimension_numbers<[1], [0], [0], [1], [0, 0, 1, 1], [], []>} : vector<96x168xf32>, vector<168x120xf32>, vector<96x120xf32> -> vector<96x120xf32>
    %c1 = arith.constant 1 : index
    %c0_5 = arith.constant 0 : index
    %c0_6 = arith.constant 0 : index
    %5 = vector.load %arg2[%c1, %c0_5, %c0_6] : memref<4x168x120xf32, #tpu.memory_space<vmem>>, vector<1x168x120xf32>
    %6 = vector.shape_cast %5 : vector<1x168x120xf32> to vector<168x120xf32>
    %cst_7 = arith.constant dense<0.000000e+00> : vector<96x120xf32>
    %7 = tpu.matmul %1, %6, %cst_7 {dimension_numbers = #tpu.dot_dimension_numbers<[1], [0], [0], [1], [0, 0, 1, 1], [], []>} : vector<96x168xf32>, vector<168x120xf32>, vector<96x120xf32> -> vector<96x120xf32>
    %8 = arith.maximumf %4, %7 : vector<96x120xf32>
    %c2 = arith.constant 2 : index
    %c0_8 = arith.constant 0 : index
    %c0_9 = arith.constant 0 : index
    %9 = vector.load %arg2[%c2, %c0_8, %c0_9] : memref<4x168x120xf32, #tpu.memory_space<vmem>>, vector<1x168x120xf32>
    %10 = vector.shape_cast %9 : vector<1x168x120xf32> to vector<168x120xf32>
    %cst_10 = arith.constant dense<0.000000e+00> : vector<96x120xf32>
    %11 = tpu.matmul %1, %10, %cst_10 {dimension_numbers = #tpu.dot_dimension_numbers<[1], [0], [0], [1], [0, 0, 1, 1], [], []>} : vector<96x168xf32>, vector<168x120xf32>, vector<96x120xf32> -> vector<96x120xf32>
    %12 = arith.maximumf %8, %11 : vector<96x120xf32>
    %c3 = arith.constant 3 : index
    %c0_11 = arith.constant 0 : index
    %c0_12 = arith.constant 0 : index
    %13 = vector.load %arg2[%c3, %c0_11, %c0_12] : memref<4x168x120xf32, #tpu.memory_space<vmem>>, vector<1x168x120xf32>
    %14 = vector.shape_cast %13 : vector<1x168x120xf32> to vector<168x120xf32>
    %cst_13 = arith.constant dense<0.000000e+00> : vector<96x120xf32>
    %15 = tpu.matmul %1, %14, %cst_13 {dimension_numbers = #tpu.dot_dimension_numbers<[1], [0], [0], [1], [0, 0, 1, 1], [], []>} : vector<96x168xf32>, vector<168x120xf32>, vector<96x120xf32> -> vector<96x120xf32>
    %16 = arith.maximumf %12, %15 : vector<96x120xf32>
    %c0_14 = arith.constant 0 : index
    %c0_15 = arith.constant 0 : index
    %17 = vector.load %arg3[%c0_14, %c0_15] : memref<1x120xf32, #tpu.memory_space<vmem>>, vector<1x120xf32>
    %18 = vector.broadcast %17 : vector<1x120xf32> to vector<96x120xf32>
    %19 = arith.addf %16, %18 : vector<96x120xf32>
    %cst_16 = arith.constant 0.000000e+00 : f32
    %20 = vector.broadcast %cst_16 : f32 to vector<96x120xf32>
    %21 = arith.maximumf %19, %20 : vector<96x120xf32>
    %c0_17 = arith.constant 0 : index
    %c0_18 = arith.constant 0 : index
    %22 = vector.load %arg9[%c0_17, %c0_18] : memref<96x120xf32, #tpu.memory_space<vmem>>, vector<96x120xf32>
    tpu.vector_store %arg9[%c0_17, %c0_18], %21 {strides = array<i32>} : memref<96x120xf32, #tpu.memory_space<vmem>>, vector<96x120xf32>,
    %c0_19 = arith.constant 0 : index
    %c0_20 = arith.constant 0 : index
    %23 = vector.load %arg9[%c0_19, %c0_20] : memref<96x120xf32, #tpu.memory_space<vmem>>, vector<32x120xf32>
    %c0_21 = arith.constant 0 : index
    %c0_22 = arith.constant 0 : index
    %c0_23 = arith.constant 0 : index
    %24 = vector.load %arg4[%c0_21, %c0_22, %c0_23] : memref<10x120x80xf32, #tpu.memory_space<vmem>>, vector<1x120x80xf32>
    %25 = vector.shape_cast %24 : vector<1x120x80xf32> to vector<120x80xf32>
    %cst_24 = arith.constant dense<0.000000e+00> : vector<32x80xf32>
    %26 = tpu.matmul %23, %25, %cst_24 {dimension_numbers = #tpu.dot_dimension_numbers<[1], [0], [0], [1], [0, 0, 1, 1], [], []>} : vector<32x120xf32>, vector<120x80xf32>, vector<32x80xf32> -> vector<32x80xf32>
    %c48 = arith.constant 48 : index
    %c0_25 = arith.constant 0 : index
    %27 = vector.load %arg9[%c48, %c0_25] : memref<96x120xf32, #tpu.memory_space<vmem>>, vector<32x120xf32>
    %c1_26 = arith.constant 1 : index
    %c0_27 = arith.constant 0 : index
    %c0_28 = arith.constant 0 : index
    %28 = vector.load %arg4[%c1_26, %c0_27, %c0_28] : memref<10x120x80xf32, #tpu.memory_space<vmem>>, vector<1x120x80xf32>
    %29 = vector.shape_cast %28 : vector<1x120x80xf32> to vector<120x80xf32>
    %cst_29 = arith.constant dense<0.000000e+00> : vector<32x80xf32>
    %30 = tpu.matmul %27, %29, %cst_29 {dimension_numbers = #tpu.dot_dimension_numbers<[1], [0], [0], [1], [0, 0, 1, 1], [], []>} : vector<32x120xf32>, vector<120x80xf32>, vector<32x80xf32> -> vector<32x80xf32>
    %31 = arith.addf %26, %30 : vector<32x80xf32>
    %c8 = arith.constant 8 : index
    %c0_30 = arith.constant 0 : index
    %32 = vector.load %arg9[%c8, %c0_30] : memref<96x120xf32, #tpu.memory_space<vmem>>, vector<32x120xf32>
    %c2_31 = arith.constant 2 : index
    %c0_32 = arith.constant 0 : index
    %c0_33 = arith.constant 0 : index
    %33 = vector.load %arg4[%c2_31, %c0_32, %c0_33] : memref<10x120x80xf32, #tpu.memory_space<vmem>>, vector<1x120x80xf32>
    %34 = vector.shape_cast %33 : vector<1x120x80xf32> to vector<120x80xf32>
    %cst_34 = arith.constant dense<0.000000e+00> : vector<32x80xf32>
    %35 = tpu.matmul %32, %34, %cst_34 {dimension_numbers = #tpu.dot_dimension_numbers<[1], [0], [0], [1], [0, 0, 1, 1], [], []>} : vector<32x120xf32>, vector<120x80xf32>, vector<32x80xf32> -> vector<32x80xf32>
    %36 = arith.addf %31, %35 : vector<32x80xf32>
    %c56 = arith.constant 56 : index
    %c0_35 = arith.constant 0 : index
    %37 = vector.load %arg9[%c56, %c0_35] : memref<96x120xf32, #tpu.memory_space<vmem>>, vector<32x120xf32>
    %c3_36 = arith.constant 3 : index
    %c0_37 = arith.constant 0 : index
    %c0_38 = arith.constant 0 : index
    %38 = vector.load %arg4[%c3_36, %c0_37, %c0_38] : memref<10x120x80xf32, #tpu.memory_space<vmem>>, vector<1x120x80xf32>
    %39 = vector.shape_cast %38 : vector<1x120x80xf32> to vector<120x80xf32>
    %cst_39 = arith.constant dense<0.000000e+00> : vector<32x80xf32>
    %40 = tpu.matmul %37, %39, %cst_39 {dimension_numbers = #tpu.dot_dimension_numbers<[1], [0], [0], [1], [0, 0, 1, 1], [], []>} : vector<32x120xf32>, vector<120x80xf32>, vector<32x80xf32> -> vector<32x80xf32>
    %41 = arith.addf %36, %40 : vector<32x80xf32>
    %c16 = arith.constant 16 : index
    %c0_40 = arith.constant 0 : index
    %42 = vector.load %arg9[%c16, %c0_40] : memref<96x120xf32, #tpu.memory_space<vmem>>, vector<32x120xf32>
    %c4 = arith.constant 4 : index
    %c0_41 = arith.constant 0 : index
    %c0_42 = arith.constant 0 : index
    %43 = vector.load %arg4[%c4, %c0_41, %c0_42] : memref<10x120x80xf32, #tpu.memory_space<vmem>>, vector<1x120x80xf32>
    %44 = vector.shape_cast %43 : vector<1x120x80xf32> to vector<120x80xf32>
    %cst_43 = arith.constant dense<0.000000e+00> : vector<32x80xf32>
    %45 = tpu.matmul %42, %44, %cst_43 {dimension_numbers = #tpu.dot_dimension_numbers<[1], [0], [0], [1], [0, 0, 1, 1], [], []>} : vector<32x120xf32>, vector<120x80xf32>, vector<32x80xf32> -> vector<32x80xf32>
    %46 = arith.addf %41, %45 : vector<32x80xf32>
    %c0_44 = arith.constant 0 : index
    %c0_45 = arith.constant 0 : index
    %47 = vector.load %arg9[%c0_44, %c0_45] : memref<96x120xf32, #tpu.memory_space<vmem>>, vector<32x120xf32>
    %c5 = arith.constant 5 : index
    %c0_46 = arith.constant 0 : index
    %c0_47 = arith.constant 0 : index
    %48 = vector.load %arg4[%c5, %c0_46, %c0_47] : memref<10x120x80xf32, #tpu.memory_space<vmem>>, vector<1x120x80xf32>
    %49 = vector.shape_cast %48 : vector<1x120x80xf32> to vector<120x80xf32>
    %cst_48 = arith.constant dense<0.000000e+00> : vector<32x80xf32>
    %50 = tpu.matmul %47, %49, %cst_48 {dimension_numbers = #tpu.dot_dimension_numbers<[1], [0], [0], [1], [0, 0, 1, 1], [], []>} : vector<32x120xf32>, vector<120x80xf32>, vector<32x80xf32> -> vector<32x80xf32>
    %c48_49 = arith.constant 48 : index
    %c0_50 = arith.constant 0 : index
    %51 = vector.load %arg9[%c48_49, %c0_50] : memref<96x120xf32, #tpu.memory_space<vmem>>, vector<32x120xf32>
    %c6 = arith.constant 6 : index
    %c0_51 = arith.constant 0 : index
    %c0_52 = arith.constant 0 : index
    %52 = vector.load %arg4[%c6, %c0_51, %c0_52] : memref<10x120x80xf32, #tpu.memory_space<vmem>>, vector<1x120x80xf32>
    %53 = vector.shape_cast %52 : vector<1x120x80xf32> to vector<120x80xf32>
    %cst_53 = arith.constant dense<0.000000e+00> : vector<32x80xf32>
    %54 = tpu.matmul %51, %53, %cst_53 {dimension_numbers = #tpu.dot_dimension_numbers<[1], [0], [0], [1], [0, 0, 1, 1], [], []>} : vector<32x120xf32>, vector<120x80xf32>, vector<32x80xf32> -> vector<32x80xf32>
    %55 = arith.addf %50, %54 : vector<32x80xf32>
    %c8_54 = arith.constant 8 : index
    %c0_55 = arith.constant 0 : index
    %56 = vector.load %arg9[%c8_54, %c0_55] : memref<96x120xf32, #tpu.memory_space<vmem>>, vector<32x120xf32>
    %c7 = arith.constant 7 : index
    %c0_56 = arith.constant 0 : index
    %c0_57 = arith.constant 0 : index
    %57 = vector.load %arg4[%c7, %c0_56, %c0_57] : memref<10x120x80xf32, #tpu.memory_space<vmem>>, vector<1x120x80xf32>
    %58 = vector.shape_cast %57 : vector<1x120x80xf32> to vector<120x80xf32>
    %cst_58 = arith.constant dense<0.000000e+00> : vector<32x80xf32>
    %59 = tpu.matmul %56, %58, %cst_58 {dimension_numbers = #tpu.dot_dimension_numbers<[1], [0], [0], [1], [0, 0, 1, 1], [], []>} : vector<32x120xf32>, vector<120x80xf32>, vector<32x80xf32> -> vector<32x80xf32>
    %60 = arith.addf %55, %59 : vector<32x80xf32>
    %c56_59 = arith.constant 56 : index
    %c0_60 = arith.constant 0 : index
    %61 = vector.load %arg9[%c56_59, %c0_60] : memref<96x120xf32, #tpu.memory_space<vmem>>, vector<32x120xf32>
    %c8_61 = arith.constant 8 : index
    %c0_62 = arith.constant 0 : index
    %c0_63 = arith.constant 0 : index
    %62 = vector.load %arg4[%c8_61, %c0_62, %c0_63] : memref<10x120x80xf32, #tpu.memory_space<vmem>>, vector<1x120x80xf32>
    %63 = vector.shape_cast %62 : vector<1x120x80xf32> to vector<120x80xf32>
    %cst_64 = arith.constant dense<0.000000e+00> : vector<32x80xf32>
    %64 = tpu.matmul %61, %63, %cst_64 {dimension_numbers = #tpu.dot_dimension_numbers<[1], [0], [0], [1], [0, 0, 1, 1], [], []>} : vector<32x120xf32>, vector<120x80xf32>, vector<32x80xf32> -> vector<32x80xf32>
    %65 = arith.addf %60, %64 : vector<32x80xf32>
    %c16_65 = arith.constant 16 : index
    %c0_66 = arith.constant 0 : index
    %66 = vector.load %arg9[%c16_65, %c0_66] : memref<96x120xf32, #tpu.memory_space<vmem>>, vector<32x120xf32>
    %c9 = arith.constant 9 : index
    %c0_67 = arith.constant 0 : index
    %c0_68 = arith.constant 0 : index
    %67 = vector.load %arg4[%c9, %c0_67, %c0_68] : memref<10x120x80xf32, #tpu.memory_space<vmem>>, vector<1x120x80xf32>
    %68 = vector.shape_cast %67 : vector<1x120x80xf32> to vector<120x80xf32>
    %cst_69 = arith.constant dense<0.000000e+00> : vector<32x80xf32>
    %69 = tpu.matmul %66, %68, %cst_69 {dimension_numbers = #tpu.dot_dimension_numbers<[1], [0], [0], [1], [0, 0, 1, 1], [], []>} : vector<32x120xf32>, vector<120x80xf32>, vector<32x80xf32> -> vector<32x80xf32>
    %70 = arith.addf %65, %69 : vector<32x80xf32>
    %71 = arith.maximumf %46, %70 : vector<32x80xf32>
    %c48_70 = arith.constant 48 : index
    %c0_71 = arith.constant 0 : index
    %72 = vector.load %arg9[%c48_70, %c0_71] : memref<96x120xf32, #tpu.memory_space<vmem>>, vector<32x120xf32>
    %c0_72 = arith.constant 0 : index
    %c0_73 = arith.constant 0 : index
    %c0_74 = arith.constant 0 : index
    %73 = vector.load %arg4[%c0_72, %c0_73, %c0_74] : memref<10x120x80xf32, #tpu.memory_space<vmem>>, vector<1x120x80xf32>
    %74 = vector.shape_cast %73 : vector<1x120x80xf32> to vector<120x80xf32>
    %cst_75 = arith.constant dense<0.000000e+00> : vector<32x80xf32>
    %75 = tpu.matmul %72, %74, %cst_75 {dimension_numbers = #tpu.dot_dimension_numbers<[1], [0], [0], [1], [0, 0, 1, 1], [], []>} : vector<32x120xf32>, vector<120x80xf32>, vector<32x80xf32> -> vector<32x80xf32>
    %c8_76 = arith.constant 8 : index
    %c0_77 = arith.constant 0 : index
    %76 = vector.load %arg9[%c8_76, %c0_77] : memref<96x120xf32, #tpu.memory_space<vmem>>, vector<32x120xf32>
    %c1_78 = arith.constant 1 : index
    %c0_79 = arith.constant 0 : index
    %c0_80 = arith.constant 0 : index
    %77 = vector.load %arg4[%c1_78, %c0_79, %c0_80] : memref<10x120x80xf32, #tpu.memory_space<vmem>>, vector<1x120x80xf32>
    %78 = vector.shape_cast %77 : vector<1x120x80xf32> to vector<120x80xf32>
    %cst_81 = arith.constant dense<0.000000e+00> : vector<32x80xf32>
    %79 = tpu.matmul %76, %78, %cst_81 {dimension_numbers = #tpu.dot_dimension_numbers<[1], [0], [0], [1], [0, 0, 1, 1], [], []>} : vector<32x120xf32>, vector<120x80xf32>, vector<32x80xf32> -> vector<32x80xf32>
    %80 = arith.addf %75, %79 : vector<32x80xf32>
    %c56_82 = arith.constant 56 : index
    %c0_83 = arith.constant 0 : index
    %81 = vector.load %arg9[%c56_82, %c0_83] : memref<96x120xf32, #tpu.memory_space<vmem>>, vector<32x120xf32>
    %c2_84 = arith.constant 2 : index
    %c0_85 = arith.constant 0 : index
    %c0_86 = arith.constant 0 : index
    %82 = vector.load %arg4[%c2_84, %c0_85, %c0_86] : memref<10x120x80xf32, #tpu.memory_space<vmem>>, vector<1x120x80xf32>
    %83 = vector.shape_cast %82 : vector<1x120x80xf32> to vector<120x80xf32>
    %cst_87 = arith.constant dense<0.000000e+00> : vector<32x80xf32>
    %84 = tpu.matmul %81, %83, %cst_87 {dimension_numbers = #tpu.dot_dimension_numbers<[1], [0], [0], [1], [0, 0, 1, 1], [], []>} : vector<32x120xf32>, vector<120x80xf32>, vector<32x80xf32> -> vector<32x80xf32>
    %85 = arith.addf %80, %84 : vector<32x80xf32>
    %c16_88 = arith.constant 16 : index
    %c0_89 = arith.constant 0 : index
    %86 = vector.load %arg9[%c16_88, %c0_89] : memref<96x120xf32, #tpu.memory_space<vmem>>, vector<32x120xf32>
    %c3_90 = arith.constant 3 : index
    %c0_91 = arith.constant 0 : index
    %c0_92 = arith.constant 0 : index
    %87 = vector.load %arg4[%c3_90, %c0_91, %c0_92] : memref<10x120x80xf32, #tpu.memory_space<vmem>>, vector<1x120x80xf32>
    %88 = vector.shape_cast %87 : vector<1x120x80xf32> to vector<120x80xf32>
    %cst_93 = arith.constant dense<0.000000e+00> : vector<32x80xf32>
    %89 = tpu.matmul %86, %88, %cst_93 {dimension_numbers = #tpu.dot_dimension_numbers<[1], [0], [0], [1], [0, 0, 1, 1], [], []>} : vector<32x120xf32>, vector<120x80xf32>, vector<32x80xf32> -> vector<32x80xf32>
    %90 = arith.addf %85, %89 : vector<32x80xf32>
    %c64 = arith.constant 64 : index
    %c0_94 = arith.constant 0 : index
    %91 = vector.load %arg9[%c64, %c0_94] : memref<96x120xf32, #tpu.memory_space<vmem>>, vector<32x120xf32>
    %c4_95 = arith.constant 4 : index
    %c0_96 = arith.constant 0 : index
    %c0_97 = arith.constant 0 : index
    %92 = vector.load %arg4[%c4_95, %c0_96, %c0_97] : memref<10x120x80xf32, #tpu.memory_space<vmem>>, vector<1x120x80xf32>
    %93 = vector.shape_cast %92 : vector<1x120x80xf32> to vector<120x80xf32>
    %cst_98 = arith.constant dense<0.000000e+00> : vector<32x80xf32>
    %94 = tpu.matmul %91, %93, %cst_98 {dimension_numbers = #tpu.dot_dimension_numbers<[1], [0], [0], [1], [0, 0, 1, 1], [], []>} : vector<32x120xf32>, vector<120x80xf32>, vector<32x80xf32> -> vector<32x80xf32>
    %95 = arith.addf %90, %94 : vector<32x80xf32>
    %96 = arith.maximumf %71, %95 : vector<32x80xf32>
    %c48_99 = arith.constant 48 : index
    %c0_100 = arith.constant 0 : index
    %97 = vector.load %arg9[%c48_99, %c0_100] : memref<96x120xf32, #tpu.memory_space<vmem>>, vector<32x120xf32>
    %c5_101 = arith.constant 5 : index
    %c0_102 = arith.constant 0 : index
    %c0_103 = arith.constant 0 : index
    %98 = vector.load %arg4[%c5_101, %c0_102, %c0_103] : memref<10x120x80xf32, #tpu.memory_space<vmem>>, vector<1x120x80xf32>
    %99 = vector.shape_cast %98 : vector<1x120x80xf32> to vector<120x80xf32>
    %cst_104 = arith.constant dense<0.000000e+00> : vector<32x80xf32>
    %100 = tpu.matmul %97, %99, %cst_104 {dimension_numbers = #tpu.dot_dimension_numbers<[1], [0], [0], [1], [0, 0, 1, 1], [], []>} : vector<32x120xf32>, vector<120x80xf32>, vector<32x80xf32> -> vector<32x80xf32>
    %c8_105 = arith.constant 8 : index
    %c0_106 = arith.constant 0 : index
    %101 = vector.load %arg9[%c8_105, %c0_106] : memref<96x120xf32, #tpu.memory_space<vmem>>, vector<32x120xf32>
    %c6_107 = arith.constant 6 : index
    %c0_108 = arith.constant 0 : index
    %c0_109 = arith.constant 0 : index
    %102 = vector.load %arg4[%c6_107, %c0_108, %c0_109] : memref<10x120x80xf32, #tpu.memory_space<vmem>>, vector<1x120x80xf32>
    %103 = vector.shape_cast %102 : vector<1x120x80xf32> to vector<120x80xf32>
    %cst_110 = arith.constant dense<0.000000e+00> : vector<32x80xf32>
    %104 = tpu.matmul %101, %103, %cst_110 {dimension_numbers = #tpu.dot_dimension_numbers<[1], [0], [0], [1], [0, 0, 1, 1], [], []>} : vector<32x120xf32>, vector<120x80xf32>, vector<32x80xf32> -> vector<32x80xf32>
    %105 = arith.addf %100, %104 : vector<32x80xf32>
    %c56_111 = arith.constant 56 : index
    %c0_112 = arith.constant 0 : index
    %106 = vector.load %arg9[%c56_111, %c0_112] : memref<96x120xf32, #tpu.memory_space<vmem>>, vector<32x120xf32>
    %c7_113 = arith.constant 7 : index
    %c0_114 = arith.constant 0 : index
    %c0_115 = arith.constant 0 : index
    %107 = vector.load %arg4[%c7_113, %c0_114, %c0_115] : memref<10x120x80xf32, #tpu.memory_space<vmem>>, vector<1x120x80xf32>
    %108 = vector.shape_cast %107 : vector<1x120x80xf32> to vector<120x80xf32>
    %cst_116 = arith.constant dense<0.000000e+00> : vector<32x80xf32>
    %109 = tpu.matmul %106, %108, %cst_116 {dimension_numbers = #tpu.dot_dimension_numbers<[1], [0], [0], [1], [0, 0, 1, 1], [], []>} : vector<32x120xf32>, vector<120x80xf32>, vector<32x80xf32> -> vector<32x80xf32>
    %110 = arith.addf %105, %109 : vector<32x80xf32>
    %c16_117 = arith.constant 16 : index
    %c0_118 = arith.constant 0 : index
    %111 = vector.load %arg9[%c16_117, %c0_118] : memref<96x120xf32, #tpu.memory_space<vmem>>, vector<32x120xf32>
    %c8_119 = arith.constant 8 : index
    %c0_120 = arith.constant 0 : index
    %c0_121 = arith.constant 0 : index
    %112 = vector.load %arg4[%c8_119, %c0_120, %c0_121] : memref<10x120x80xf32, #tpu.memory_space<vmem>>, vector<1x120x80xf32>
    %113 = vector.shape_cast %112 : vector<1x120x80xf32> to vector<120x80xf32>
    %cst_122 = arith.constant dense<0.000000e+00> : vector<32x80xf32>
    %114 = tpu.matmul %111, %113, %cst_122 {dimension_numbers = #tpu.dot_dimension_numbers<[1], [0], [0], [1], [0, 0, 1, 1], [], []>} : vector<32x120xf32>, vector<120x80xf32>, vector<32x80xf32> -> vector<32x80xf32>
    %115 = arith.addf %110, %114 : vector<32x80xf32>
    %c64_123 = arith.constant 64 : index
    %c0_124 = arith.constant 0 : index
    %116 = vector.load %arg9[%c64_123, %c0_124] : memref<96x120xf32, #tpu.memory_space<vmem>>, vector<32x120xf32>
    %c9_125 = arith.constant 9 : index
    %c0_126 = arith.constant 0 : index
    %c0_127 = arith.constant 0 : index
    %117 = vector.load %arg4[%c9_125, %c0_126, %c0_127] : memref<10x120x80xf32, #tpu.memory_space<vmem>>, vector<1x120x80xf32>
    %118 = vector.shape_cast %117 : vector<1x120x80xf32> to vector<120x80xf32>
    %cst_128 = arith.constant dense<0.000000e+00> : vector<32x80xf32>
    %119 = tpu.matmul %116, %118, %cst_128 {dimension_numbers = #tpu.dot_dimension_numbers<[1], [0], [0], [1], [0, 0, 1, 1], [], []>} : vector<32x120xf32>, vector<120x80xf32>, vector<32x80xf32> -> vector<32x80xf32>
    %120 = arith.addf %115, %119 : vector<32x80xf32>
    %121 = arith.maximumf %96, %120 : vector<32x80xf32>
    %c0_129 = arith.constant 0 : index
    %c0_130 = arith.constant 0 : index
    %122 = vector.load %arg5[%c0_129, %c0_130] : memref<1x80xf32, #tpu.memory_space<vmem>>, vector<1x80xf32>
    %123 = vector.broadcast %122 : vector<1x80xf32> to vector<32x80xf32>
    %124 = arith.addf %121, %123 : vector<32x80xf32>
    %cst_131 = arith.constant 0.000000e+00 : f32
    %125 = vector.broadcast %cst_131 : f32 to vector<32x80xf32>
    %126 = arith.maximumf %124, %125 : vector<32x80xf32>
    %127 = vector.extract_strided_slice %126 {offsets = [0, 0], sizes = [8, 80], strides = [1, 1]} : vector<32x80xf32> to vector<8x80xf32>
    %c0_132 = arith.constant 0 : index
    %c0_133 = arith.constant 0 : index
    %c0_134 = arith.constant 0 : index
    %128 = vector.load %arg6[%c0_132, %c0_133, %c0_134] : memref<4x80x128xf32, #tpu.memory_space<vmem>>, vector<1x80x128xf32>
    %129 = vector.shape_cast %128 : vector<1x80x128xf32> to vector<80x128xf32>
    %cst_135 = arith.constant dense<0.000000e+00> : vector<8x128xf32>
    %130 = tpu.matmul %127, %129, %cst_135 {dimension_numbers = #tpu.dot_dimension_numbers<[1], [0], [0], [1], [0, 0, 1, 1], [], []>} : vector<8x80xf32>, vector<80x128xf32>, vector<8x128xf32> -> vector<8x128xf32>
    %131 = vector.extract_strided_slice %126 {offsets = [8, 0], sizes = [8, 80], strides = [1, 1]} : vector<32x80xf32> to vector<8x80xf32>
    %c1_136 = arith.constant 1 : index
    %c0_137 = arith.constant 0 : index
    %c0_138 = arith.constant 0 : index
    %132 = vector.load %arg6[%c1_136, %c0_137, %c0_138] : memref<4x80x128xf32, #tpu.memory_space<vmem>>, vector<1x80x128xf32>
    %133 = vector.shape_cast %132 : vector<1x80x128xf32> to vector<80x128xf32>
    %cst_139 = arith.constant dense<0.000000e+00> : vector<8x128xf32>
    %134 = tpu.matmul %131, %133, %cst_139 {dimension_numbers = #tpu.dot_dimension_numbers<[1], [0], [0], [1], [0, 0, 1, 1], [], []>} : vector<8x80xf32>, vector<80x128xf32>, vector<8x128xf32> -> vector<8x128xf32>
    %135 = arith.addf %130, %134 : vector<8x128xf32>
    %136 = vector.extract_strided_slice %126 {offsets = [16, 0], sizes = [8, 80], strides = [1, 1]} : vector<32x80xf32> to vector<8x80xf32>
    %c2_140 = arith.constant 2 : index
    %c0_141 = arith.constant 0 : index
    %c0_142 = arith.constant 0 : index
    %137 = vector.load %arg6[%c2_140, %c0_141, %c0_142] : memref<4x80x128xf32, #tpu.memory_space<vmem>>, vector<1x80x128xf32>
    %138 = vector.shape_cast %137 : vector<1x80x128xf32> to vector<80x128xf32>
    %cst_143 = arith.constant dense<0.000000e+00> : vector<8x128xf32>
    %139 = tpu.matmul %136, %138, %cst_143 {dimension_numbers = #tpu.dot_dimension_numbers<[1], [0], [0], [1], [0, 0, 1, 1], [], []>} : vector<8x80xf32>, vector<80x128xf32>, vector<8x128xf32> -> vector<8x128xf32>
    %140 = arith.addf %135, %139 : vector<8x128xf32>
    %141 = vector.extract_strided_slice %126 {offsets = [24, 0], sizes = [8, 80], strides = [1, 1]} : vector<32x80xf32> to vector<8x80xf32>
    %c3_144 = arith.constant 3 : index
    %c0_145 = arith.constant 0 : index
    %c0_146 = arith.constant 0 : index
    %142 = vector.load %arg6[%c3_144, %c0_145, %c0_146] : memref<4x80x128xf32, #tpu.memory_space<vmem>>, vector<1x80x128xf32>
    %143 = vector.shape_cast %142 : vector<1x80x128xf32> to vector<80x128xf32>
    %cst_147 = arith.constant dense<0.000000e+00> : vector<8x128xf32>
    %144 = tpu.matmul %141, %143, %cst_147 {dimension_numbers = #tpu.dot_dimension_numbers<[1], [0], [0], [1], [0, 0, 1, 1], [], []>} : vector<8x80xf32>, vector<80x128xf32>, vector<8x128xf32> -> vector<8x128xf32>
    %145 = arith.addf %140, %144 : vector<8x128xf32>
    %c0_148 = arith.constant 0 : index
    %c0_149 = arith.constant 0 : index
    %146 = vector.load %arg7[%c0_148, %c0_149] : memref<1x128xf32, #tpu.memory_space<vmem>>, vector<1x128xf32>
    %147 = vector.broadcast %146 : vector<1x128xf32> to vector<8x128xf32>
    %148 = arith.addf %145, %147 : vector<8x128xf32>
    %c0_150 = arith.constant 0 : index
    %c0_151 = arith.constant 0 : index
    %149 = vector.load %arg8[%c0_150, %c0_151] : memref<8x128xf32, #tpu.memory_space<vmem>>, vector<8x128xf32>
    tpu.vector_store %arg8[%c0_150, %c0_151], %148 {strides = array<i32>} : memref<8x128xf32, #tpu.memory_space<vmem>>, vector<8x128xf32>,
    return
  }
  func.func @transform_0(%arg0: i32) -> (i32, i32, i32) {
    %c0_i32 = arith.constant 0 : i32
    %c0_i32_0 = arith.constant 0 : i32
    %c0_i32_1 = arith.constant 0 : i32
    return %arg0, %c0_i32, %c0_i32_0 : i32, i32, i32
  }
  func.func @transform_1(%arg0: i32) -> (i32, i32, i32) {
    %c0_i32 = arith.constant 0 : i32
    %c0_i32_0 = arith.constant 0 : i32
    %c0_i32_1 = arith.constant 0 : i32
    %c0_i32_2 = arith.constant 0 : i32
    return %c0_i32, %c0_i32_0, %c0_i32_1 : i32, i32, i32
  }
  func.func @transform_2(%arg0: i32) -> (i32, i32) {
    %c0_i32 = arith.constant 0 : i32
    %c0_i32_0 = arith.constant 0 : i32
    %c0_i32_1 = arith.constant 0 : i32
    return %c0_i32, %c0_i32_0 : i32, i32
  }
  func.func @transform_3(%arg0: i32) -> (i32, i32, i32) {
    %c0_i32 = arith.constant 0 : i32
    %c0_i32_0 = arith.constant 0 : i32
    %c0_i32_1 = arith.constant 0 : i32
    %c0_i32_2 = arith.constant 0 : i32
    return %c0_i32, %c0_i32_0, %c0_i32_1 : i32, i32, i32
  }
  func.func @transform_4(%arg0: i32) -> (i32, i32) {
    %c0_i32 = arith.constant 0 : i32
    %c0_i32_0 = arith.constant 0 : i32
    %c0_i32_1 = arith.constant 0 : i32
    return %c0_i32, %c0_i32_0 : i32, i32
  }
  func.func @transform_5(%arg0: i32) -> (i32, i32, i32) {
    %c0_i32 = arith.constant 0 : i32
    %c0_i32_0 = arith.constant 0 : i32
    %c0_i32_1 = arith.constant 0 : i32
    %c0_i32_2 = arith.constant 0 : i32
    return %c0_i32, %c0_i32_0, %c0_i32_1 : i32, i32, i32
  }
  func.func @transform_6(%arg0: i32) -> (i32, i32) {
    %c0_i32 = arith.constant 0 : i32
    %c0_i32_0 = arith.constant 0 : i32
    %c0_i32_1 = arith.constant 0 : i32
    return %c0_i32, %c0_i32_0 : i32, i32
  }
  func.func @transform_7(%arg0: i32) -> (i32, i32) {
    %c0_i32 = arith.constant 0 : i32
    %c0_i32_0 = arith.constant 0 : i32
    return %arg0, %c0_i32 : i32, i32
  }
}

</mosaic_0001>

<bundles_post_ra>
// kernel: tile.14
= control target key start
LH: loop header
LB: loop body
LE: loop exit
PB: predicated region body
PF: predicated region fallthrough
CT: control target
= control target key end

     0   :  { %s99_s10 = smov 110   ;;  %s100_s11 = smov 90   ;;  %vm3_vm0 = vcmask 80896   ;;  %vm9_vm1 = vcmask 982896   ;;  %vm15_vm2 = vcmask 900896   ;;  %vm21_vm3 = vcmask 818896   ;;  %s159_s0 = inlined_call_operand.vmem [shape: f32[12,10], index: 0, kind: input, shape index: {}]   ;;  %s160_s1 = inlined_call_operand.vmem [shape: f32[1,120], index: 1, kind: output, shape index: {}]  }
   0x1   :  { %v77_v0 = vld [vmem:[%s159_s0 + $0xb] sm:$0x1]   ;;  %v79_v1 = vld [vmem:[%s159_s0 + $0x9] sm:$0x1]   ;;  %v81_v2 = vld [vmem:[%s159_s0 + $0x7] sm:$0x1]  }
   0x2   :  { %7 = vrot.lane.b32.xlu0 %v77_v0, %s99_s10  ;;  %19 = vrot.lane.b32.xlu1 %v79_v1, %s100_s11  ;;  %s101_s14 = smov 70   ;;  %v78_v3 = vld [vmem:[%s159_s0 + $0xa] sm:$0x1]   ;;  %v80_v4 = vld [vmem:[%s159_s0 + $0x8] sm:$0x1]   ;;  %s102_s19 = smov 100  }
   0x3   :  { %31 = vrot.lane.b32.xlu2 %v81_v2, %s101_s14  ;;  %s103_s20 = smov 80   ;;  %v82_v5 = vld [vmem:[%s159_s0 + $0x6] sm:$0x1]   ;;  %s104_s23 = smov 60   ;;  %v83_v6 = vld [vmem:[%s159_s0 + $0x5] sm:$0x1]  }
   0x4   :  { %v84_v7 = vld [vmem:[%s159_s0 + $0x4] sm:$0x1]   ;;  %s105_s28 = smov 50   ;;  %s106_s29 = smov 40   ;;  %v85_v8 = vld [vmem:[%s159_s0 + $0x3] sm:$0x1]  }
   0x5   :  { %s107_s3 = smov 30   ;;  %v86_v9 = vld [vmem:[%s159_s0 + $0x2] sm:$0x1]   ;;  %v87_v10 = vld [vmem:[%s159_s0 + $0x1] sm:$0x1]   ;;  %s108_s8 = smov 20  }
   0x6   :  { %s109_s9 = smov 10   ;;  %v2_v11 = vld [vmem:[%s159_s0] sm:$0x1]   ;;  %vm27_vm4 = vcmask 736896   ;;  %vm33_vm5 = vcmask 654896   ;;  %vm39_vm6 = vcmask 572896  }
   0x7   :  { %4 = vst.msk [vmem:[#allocation0] sm:$0x1] %vm3_vm0, %v2_v11   ;;  %vm45_vm7 = vcmask 490896   ;;  %vm51_vm8 = vcmask 408896   ;;  %vm57_vm9 = vcmask 326896   ;;  %vm63_vm10 = vcmask 244896  }
   0x8   :  { %vm69_vm11 = vcmask 162896  }
   0xa   :  { %13 = vrot.lane.b32.xlu0 %v78_v3, %s102_s19  ;;  %25 = vrot.lane.b32.xlu1 %v80_v4, %s103_s20 }
   0xb   :  { %37 = vrot.lane.b32.xlu2 %v82_v5, %s104_s23 }
  0x12   :  { %43 = vrot.lane.b32.xlu0 %v83_v6, %s105_s28  ;;  %49 = vrot.lane.b32.xlu1 %v84_v7, %s106_s29 }
  0x13   :  { %55 = vrot.lane.b32.xlu2 %v85_v8, %s107_s3 }
  0x1a   :  { %61 = vrot.lane.b32.xlu0 %v86_v9, %s108_s8  ;;  %67 = vrot.lane.b32.xlu1 %v87_v10, %s109_s9 }
  0x5d   :  { %v32_v12 = vpop.permute.xlu2 %31  }
  0x65   :  { %v38_v13 = vpop.permute.xlu2 %37  }
  0x6d   :  { %v56_v14 = vpop.permute.xlu2 %55  }
  0x74   :  { %v8_v15 = vpop.permute.xlu0 %7   ;;  %v20_v16 = vpop.permute.xlu1 %19  }
  0x75   :  { %10 = vst.msk [vmem:[#allocation0] sm:$0x1] %vm9_vm1, %v8_v15  }
  0x7c   :  { %v14_v17 = vpop.permute.xlu0 %13   ;;  %v26_v18 = vpop.permute.xlu1 %25  }
  0x7d   :  { %16 = vst.msk [vmem:[#allocation0] sm:$0x1] %vm15_vm2, %v14_v17  }
  0x7e   :  { %22 = vst.msk [vmem:[#allocation0] sm:$0x1] %vm21_vm3, %v20_v16  }
  0x7f   :  { %28 = vst.msk [vmem:[#allocation0] sm:$0x1] %vm27_vm4, %v26_v18  }
  0x80   :  { %34 = vst.msk [vmem:[#allocation0] sm:$0x1] %vm33_vm5, %v32_v12  }
  0x81   :  { %40 = vst.msk [vmem:[#allocation0] sm:$0x1] %vm39_vm6, %v38_v13  }
  0x84   :  { %v44_v19 = vpop.permute.xlu0 %43   ;;  %v50_v20 = vpop.permute.xlu1 %49  }
  0x85   :  { %46 = vst.msk [vmem:[#allocation0] sm:$0x1] %vm45_vm7, %v44_v19  }
  0x86   :  { %52 = vst.msk [vmem:[#allocation0] sm:$0x1] %vm51_vm8, %v50_v20  }
  0x87   :  { %58 = vst.msk [vmem:[#allocation0] sm:$0x1] %vm57_vm9, %v56_v14  }
  0x8c   :  { %v62_v21 = vpop.permute.xlu0 %61   ;;  %v68_v22 = vpop.permute.xlu1 %67  }
  0x8d   :  { %64 = vst.msk [vmem:[#allocation0] sm:$0x1] %vm63_vm10, %v62_v21  }
  0x8e   :  { %70 = vst.msk [vmem:[#allocation0] sm:$0x1] %vm69_vm11, %v68_v22  }
  0x95   :  { %v73_v23 = vld [vmem:[#allocation0] sm:$0x1] }
  0x96   :  { %76 = vst [vmem:[%s160_s1] sm:$0x1] %v73_v23 }

// kernel: tile.13
= control target key start
LH: loop header
LB: loop body
LE: loop exit
PB: predicated region body
PF: predicated region fallthrough
CT: control target
= control target key end

     0   :  { %s28_s0 = inlined_call_operand.vmem [shape: f32[10], index: 0, kind: input, shape index: {}]   ;;  %s29_s1 = inlined_call_operand.vmem [shape: f32[12,10], index: 1, kind: output, shape index: {}]  }
   0x1   :  { %v4_v0 = vld [vmem:[%s28_s0] ss:$0 sm:$0xff] }
   0x2   :  { %5 = vst [vmem:[%s29_s1] sm:$0xff] %v4_v0 }
   0x3   :  { %8 = vst [vmem:[%s29_s1 + $0x8] sm:$0xff] %v4_v0 }

// kernel: tile.18
= control target key start
LH: loop header
LB: loop body
LE: loop exit
PB: predicated region body
PF: predicated region fallthrough
CT: control target
= control target key end

     0   :  { %s22_s0 = inlined_call_operand.vmem [shape: f32[20], index: 0, kind: input, shape index: {}]   ;;  %s23_s1 = inlined_call_operand.vmem [shape: f32[4,20], index: 1, kind: output, shape index: {}]  }
   0x1   :  { %v4_v0 = vld [vmem:[%s22_s0] ss:$0 sm:$0xff] }
   0x2   :  { %5 = vst [vmem:[%s23_s1] sm:$0xf] %v4_v0 }

// kernel: tile.19
= control target key start
LH: loop header
LB: loop body
LE: loop exit
PB: predicated region body
PF: predicated region fallthrough
CT: control target
= control target key end

     0   :  { %s37_s8 = smov 20   ;;  %s38_s9 = smov 40   ;;  %vm7_vm0 = vcmask 162816   ;;  %vm13_vm1 = vcmask 654816   ;;  %vm19_vm2 = vcmask 490816   ;;  %vm25_vm3 = vcmask 326816   ;;  %s55_s0 = inlined_call_operand.vmem [shape: f32[4,20], index: 0, kind: input, shape index: {}]   ;;  %s56_s1 = inlined_call_operand.vmem [shape: f32[1,80], index: 1, kind: output, shape index: {}]  }
   0x1   :  { %v4_v0 = vld [vmem:[%s55_s0] sm:$0xf]  ;;  %s36_s0 = smov 60  }
   0x2   :  { %5 = vst [vmem:[#allocation1] sm:$0xf] %v4_v0 }
   0x9   :  { %v10_v1 = vld [vmem:[#allocation1 + $0x3] sm:$0x1]   ;;  %v22_v2 = vld [vmem:[#allocation1 + $0x1] sm:$0x1]   ;;  %v16_v3 = vld [vmem:[#allocation1 + $0x2] sm:$0x1]  }
   0xa   :  { %11 = vrot.lane.b32.xlu0 %v10_v1, %s36_s0  ;;  %23 = vrot.lane.b32.xlu1 %v22_v2, %s37_s8  ;;  %v6_v4 = vld [vmem:[#allocation1] sm:$0x1]  }
   0xb   :  { %8 = vst.msk [vmem:[#allocation0] sm:$0x1] %vm7_vm0, %v6_v4  }
  0x12   :  { %17 = vrot.lane.b32.xlu0 %v16_v3, %s38_s9 }
  0x7c   :  { %v12_v5 = vpop.permute.xlu0 %11   ;;  %v24_v6 = vpop.permute.xlu1 %23  }
  0x7d   :  { %14 = vst.msk [vmem:[#allocation0] sm:$0x1] %vm13_vm1, %v12_v5  }
  0x84   :  { %v18_v7 = vpop.permute.xlu0 %17  }
  0x85   :  { %20 = vst.msk [vmem:[#allocation0] sm:$0x1] %vm19_vm2, %v18_v7  }
  0x86   :  { %26 = vst.msk [vmem:[#allocation0] sm:$0x1] %vm25_vm3, %v24_v6  }
  0x8d   :  { %v29_v8 = vld [vmem:[#allocation0] sm:$0x1] }
  0x8e   :  { %32 = vst [vmem:[%s56_s1] sm:$0x1] %v29_v8 }

// kernel: net_forward.1
= control target key start
LH: loop header
LB: loop body
LE: loop exit
PB: predicated region body
PF: predicated region fallthrough
CT: control target
= control target key end

     0   :  { %vm71_vm0 = vcmask 326656   ;;  %vm662_vm1 = vcmask 982016   ;;  %vm1603_vm2 = vcmask 654336   ;;  %s4318_s1 = inlined_call_operand.vmem [shape: f32[4,168,120], index: 1, kind: input, shape index: {}]   ;;  %s4319_s0 = inlined_call_operand.vmem [shape: f32[1,96,168], index: 0, kind: input, shape index: {}]   ;;  %s4320_s2 = inlined_call_operand.vmem [shape: f32[1,120], index: 2, kind: input, shape index: {}]   ;;  %s4321_s3 = inlined_call_operand.vmem [shape: f32[10,120,80], index: 3, kind: input, shape index: {}]   ;;  %s4322_s4 = inlined_call_operand.vmem [shape: f32[1,80], index: 4, kind: input, shape index: {}]   ;;  %s4323_s5 = inlined_call_operand.vmem [shape: f32[4,80,128], index: 5, kind: input, shape index: {}]   ;;  %s4324_s6 = inlined_call_operand.vmem [shape: f32[1,128], index: 6, kind: input, shape index: {}]   ;;  %s4325_s7 = inlined_call_operand.vmem [shape: f32[8,128], index: 7, kind: output, shape index: {}]  }
   0x1   :  { %v1757_v0 = vld [vmem:[%s4318_s1 + $0x120] sm:$0xff]  ;;  %v1762_v1 = vld [vmem:[%s4318_s1 + $0x148] sm:$0xff]  ;;  %v1756_v2 = vld [vmem:[%s4318_s1 + $0x118] sm:$0xff] }
   0x2   :  { %236 = vmatpush.msra.mxu2 %v1757_v0  ;;  %300 = vmatpush.msra.mxu3 %v1762_v1  ;;  %v1761_v3 = vld [vmem:[%s4318_s1 + $0x140] sm:$0xff]  ;;  %v65_v4 = vld [vmem:[%s4318_s1 + $0x78] sm:$0xff]  ;;  %v1755_v5 = vld [vmem:[%s4318_s1 + $0x110] sm:$0xff] }
   0x3   :  { %108 = vmatpush.msra.mxu0 %v65_v4  ;;  %v1760_v6 = vld [vmem:[%s4318_s1 + $0x138] sm:$0xff]  ;;  %v64_v7 = vld [vmem:[%s4318_s1 + $0x70] sm:$0xff]  ;;  %v70_v8 = vld [vmem:[%s4318_s1 + $0xa0] sm:$0xff] }
   0x4   :  { %237 = vmatpush.msra.mxu2 %v1756_v2  ;;  %301 = vmatpush.msra.mxu3 %v1761_v3  ;;  %v63_v9 = vld [vmem:[%s4318_s1 + $0x68] sm:$0xff]  ;;  %v1759_v11 = vld [vmem:[%s4318_s1 + $0x130] sm:$0xff]  ;;  %v69_v12 = vld [vmem:[%s4318_s1 + $0x98] sm:$0xff] }
   0x5   :  { %109 = vmatpush.msra.mxu0 %v64_v7  ;;  %172 = vmatpush.msra.mxu1 %v70_v8  ;;  %v1754_v10 = vld [vmem:[%s4318_s1 + $0x108] sm:$0xff]  ;;  %v62_v13 = vld [vmem:[%s4318_s1 + $0x60] sm:$0xff]  ;;  %v68_v14 = vld [vmem:[%s4318_s1 + $0x90] sm:$0xff] }
   0x6   :  { %238 = vmatpush.msra.mxu2 %v1755_v5  ;;  %302 = vmatpush.msra.mxu3 %v1760_v6  ;;  %v1753_v15 = vld [vmem:[%s4318_s1 + $0x100] sm:$0xff]  ;;  %v1758_v16 = vld [vmem:[%s4318_s1 + $0x128] sm:$0xff]  ;;  %v61_v18 = vld [vmem:[%s4318_s1 + $0x58] sm:$0xff] }
   0x7   :  { %110 = vmatpush.msra.mxu0 %v63_v9  ;;  %173 = vmatpush.msra.mxu1 %v69_v12  ;;  %v2221_v17 = vld [vmem:[%s4319_s0 + $0x8] sm:$0xff]  ;;  %v1752_v19 = vld [vmem:[%s4318_s1 + $0xf8] sm:$0xff]  ;;  %v60_v21 = vld [vmem:[%s4318_s1 + $0x50] sm:$0xff] }
   0x8   :  { %239 = vmatpush.msra.mxu2 %v1754_v10  ;;  %303 = vmatpush.msra.mxu3 %v1759_v11  ;;  %v67_v20 = vld [vmem:[%s4318_s1 + $0x88] sm:$0xff]  ;;  %v1751_v22 = vld [vmem:[%s4318_s1 + $0xf0] sm:$0xff]  ;;  %v66_v23 = vld [vmem:[%s4318_s1 + $0x80] sm:$0xff] }
   0x9   :  { %111 = vmatpush.msra.mxu0 %v62_v13  ;;  %174 = vmatpush.msra.mxu1 %v68_v14  ;;  %v59_v24 = vld [vmem:[%s4318_s1 + $0x48] sm:$0xff]  ;;  %v58_v26 = vld [vmem:[%s4318_s1 + $0x40] sm:$0xff]  ;;  %v1795_v27 = vld [vmem:[%s4318_s1 + $0x1f0] sm:$0xff] }
   0xa   :  { %240 = vmatpush.msra.mxu2 %v1753_v15  ;;  %304 = vmatpush.msra.mxu3 %v1758_v16  ;;  %v1750_v25 = vld [vmem:[%s4318_s1 + $0xe8] sm:$0xff]  ;;  %v1749_v28 = vld [vmem:[%s4318_s1 + $0xe0] sm:$0xff]  ;;  %v2263_v29 = vld [vmem:[%s4319_s0 + $0x18] sm:$0xff] }
   0xb   :  { %1763 = vmatmul.msk.f32.vlgmr.msra.gmra.mxu3 %vm71_vm0, %v2221_v17  ;;  %112 = vmatpush.msra.mxu0 %v61_v18  ;;  %v57_v30 = vld [vmem:[%s4318_s1 + $0x38] sm:$0xff]  ;;  %v1790_v32 = vld [vmem:[%s4318_s1 + $0x1c8] sm:$0xff]  ;;  %v56_v33 = vld [vmem:[%s4318_s1 + $0x30] sm:$0xff] }
   0xc   :  { %241 = vmatpush.msra.mxu2 %v1752_v19  ;;  %175 = vmatpush.msra.mxu1 %v67_v20  ;;  %v1748_v31 = vld [vmem:[%s4318_s1 + $0xd8] sm:$0xff]  ;;  %v1789_v34 = vld [vmem:[%s4318_s1 + $0x1c0] sm:$0xff]  ;;  %v1747_v35 = vld [vmem:[%s4318_s1 + $0xd0] sm:$0xff] }
   0xd   :  { %113 = vmatpush.msra.mxu0 %v60_v21  ;;  %440 = vmatpush.msrb.mxu3 %v1795_v27  ;;  %v1788_v36 = vld [vmem:[%s4318_s1 + $0x1b8] sm:$0xff]  ;;  %v55_v37 = vld [vmem:[%s4318_s1 + $0x28] sm:$0xff]  ;;  %v1787_v40 = vld [vmem:[%s4318_s1 + $0x1b0] sm:$0xff] }
   0xe   :  { %242 = vmatpush.msra.mxu2 %v1751_v22  ;;  %176 = vmatpush.msra.mxu1 %v66_v23  ;;  %v1794_v38 = vld [vmem:[%s4318_s1 + $0x1e8] sm:$0xff]  ;;  %v54_v41 = vld [vmem:[%s4318_s1 + $0x20] sm:$0xff]  ;;  %v53_v44 = vld [vmem:[%s4318_s1 + $0x18] sm:$0xff] }
   0xf   :  { %1730 = vmatmul.msk.f32.vlgmr.msra.gmra.mxu1 %vm71_vm0, %v2221_v17  ;;  %114 = vmatpush.msra.mxu0 %v59_v24  ;;  %v1746_v39 = vld [vmem:[%s4318_s1 + $0xc8] sm:$0xff]  ;;  %v1745_v42 = vld [vmem:[%s4318_s1 + $0xc0] sm:$0xff]  ;;  %v1744_v45 = vld [vmem:[%s4318_s1 + $0xb8] sm:$0xff] }
  0x10   :  { %243 = vmatpush.msra.mxu2 %v1750_v25  ;;  %376 = vmatpush.msrb.mxu1 %v1790_v32  ;;  %v2311_v43 = vld [vmem:[%s4319_s0 + $0x28] sm:$0xff]  ;;  %v52_v46 = vld [vmem:[%s4318_s1 + $0x10] sm:$0xff]  ;;  %v2339_v51 = vld [vmem:[%s4319_s0] sm:$0xff] }
  0x11   :  { %115 = vmatpush.msra.mxu0 %v58_v26  ;;  %441 = vmatpush.msrb.mxu3 %v1794_v38  ;;  %v1743_v47 = vld [vmem:[%s4318_s1 + $0xb0] sm:$0xff]  ;;  %v1786_v48 = vld [vmem:[%s4318_s1 + $0x1a8] sm:$0xff]  ;;  %v50_v52 = vld [vmem:[%s4318_s1] sm:$0xff] }
  0x12   :  { %244 = vmatpush.msra.mxu2 %v1749_v28  ;;  %377 = vmatpush.msrb.mxu1 %v1789_v34  ;;  %v51_v49 = vld [vmem:[%s4318_s1 + $0x8] sm:$0xff]  ;;  %v1828_v53 = vld [vmem:[%s4318_s1 + $0x298] sm:$0xff]  ;;  %v1823_v55 = vld [vmem:[%s4318_s1 + $0x270] sm:$0xff] }
  0x13   :  { %1764 = vmatmul.msk.f32.gmra.mxu3 %vm71_vm0, %v2263_v29  ;;  %116 = vmatpush.msra.mxu0 %v57_v30  ;;  %v1742_v50 = vld [vmem:[%s4318_s1 + $0xa8] sm:$0xff]  ;;  %v2352_v54 = vld [vmem:[%s4319_s0 + $0x38] sm:$0xff]  ;;  %v1827_v56 = vld [vmem:[%s4318_s1 + $0x290] sm:$0xff] }
  0x14   :  { %245 = vmatpush.msra.mxu2 %v1748_v31  ;;  %378 = vmatpush.msrb.mxu1 %v1788_v36  ;;  %v1822_v57 = vld [vmem:[%s4318_s1 + $0x268] sm:$0xff]  ;;  %v1785_v58 = vld [vmem:[%s4318_s1 + $0x1a0] sm:$0xff]  ;;  %v2382_v62 = vld [vmem:[%s4319_s0 + $0x10] sm:$0xff] }
  0x15   :  { %117 = vmatpush.msra.mxu0 %v56_v33  ;;  %v1793_v59 = vld [vmem:[%s4318_s1 + $0x1e0] sm:$0xff]  ;;  %v1826_v61 = vld [vmem:[%s4318_s1 + $0x288] sm:$0xff]  ;;  %v1820_v63 = vld [vmem:[%s4318_s1 + $0x258] sm:$0xff] }
  0x16   :  { %246 = vmatpush.msra.mxu2 %v1747_v35  ;;  %379 = vmatpush.msrb.mxu1 %v1787_v40  ;;  %v1821_v60 = vld [vmem:[%s4318_s1 + $0x260] sm:$0xff]  ;;  %v2392_v0 = vld [vmem:[%s4319_s0 + $0x48] sm:$0xff]  ;;  %v1819_v1 = vld [vmem:[%s4318_s1 + $0x250] sm:$0xff] }
  0x17   :  { %1731 = vmatmul.msk.f32.gmra.mxu1 %vm71_vm0, %v2263_v29  ;;  %118 = vmatpush.msra.mxu0 %v55_v37  ;;  %v1784_v2 = vld [vmem:[%s4318_s1 + $0x198] sm:$0xff]  ;;  %v1818_v3 = vld [vmem:[%s4318_s1 + $0x248] sm:$0xff]  ;;  %v1783_v4 = vld [vmem:[%s4318_s1 + $0x190] sm:$0xff] }
  0x18   :  { %247 = vmatpush.msra.mxu2 %v1746_v39  ;;  %380 = vmatpush.msrb.mxu1 %v1786_v48  ;;  %v1817_v5 = vld [vmem:[%s4318_s1 + $0x240] sm:$0xff]  ;;  %v2423_v7 = vld [vmem:[%s4319_s0 + $0x58] sm:$0xff]  ;;  %v1782_v9 = vld [vmem:[%s4318_s1 + $0x188] sm:$0xff] }
  0x19   :  { %119 = vmatpush.msra.mxu0 %v54_v41  ;;  %442 = vmatpush.msrb.mxu3 %v1793_v59  ;;  %v2416_v6 = vld [vmem:[%s4319_s0 + $0x20] sm:$0xff]  ;;  %v1816_v8 = vld [vmem:[%s4318_s1 + $0x238] sm:$0xff]  ;;  %v1815_v10 = vld [vmem:[%s4318_s1 + $0x230] sm:$0xff] }
  0x1a   :  { %248 = vmatpush.msra.mxu2 %v1745_v42  ;;  %381 = vmatpush.msrb.mxu1 %v1785_v58  ;;  %v2441_v11 = vld [vmem:[%s4319_s0 + $0x30] sm:$0xff]  ;;  %v2448_v12 = vld [vmem:[%s4319_s0 + $0x68] sm:$0xff]  ;;  %v1792_v13 = vld [vmem:[%s4318_s1 + $0x1d8] sm:$0xff] }
  0x1b   :  { %1765 = vmatmul.msk.f32.gmra.mxu3 %vm71_vm0, %v2311_v43  ;;  %120 = vmatpush.msra.mxu0 %v53_v44  ;;  %v1781_v14 = vld [vmem:[%s4318_s1 + $0x180] sm:$0xff]  ;;  %v1814_v16 = vld [vmem:[%s4318_s1 + $0x228] sm:$0xff]  ;;  %v2476_v19 = vld [vmem:[%s4319_s0 + $0x78] sm:$0xff] }
  0x1c   :  { %249 = vmatpush.msra.mxu2 %v1744_v45  ;;  %382 = vmatpush.msrb.mxu1 %v1784_v2  ;;  %v1825_v15 = vld [vmem:[%s4318_s1 + $0x280] sm:$0xff]  ;;  %v1780_v20 = vld [vmem:[%s4318_s1 + $0x178] sm:$0xff]  ;;  %v1779_v22 = vld [vmem:[%s4318_s1 + $0x170] sm:$0xff] }
  0x1d   :  { %121 = vmatpush.msra.mxu0 %v52_v46  ;;  %443 = vmatpush.msrb.mxu3 %v1792_v13  ;;  %v2469_v18 = vld [vmem:[%s4319_s0 + $0x40] sm:$0xff]  ;;  %v2494_v23 = vld [vmem:[%s4319_s0 + $0x50] sm:$0xff]  ;;  %v2501_v24 = vld [vmem:[%s4319_s0 + $0x88] sm:$0xff] }
  0x1e   :  { %250 = vmatpush.msra.mxu2 %v1743_v47  ;;  %383 = vmatpush.msrb.mxu1 %v1783_v4  ;;  %v1813_v21 = vld [vmem:[%s4318_s1 + $0x220] sm:$0xff]  ;;  %v1812_v25 = vld [vmem:[%s4318_s1 + $0x218] sm:$0xff]  ;;  %v1778_v26 = vld [vmem:[%s4318_s1 + $0x168] sm:$0xff] }
  0x1f   :  { %1732 = vmatmul.msk.f32.gmra.mxu1 %vm71_vm0, %v2311_v43  ;;  %122 = vmatpush.msra.mxu0 %v51_v49  ;;  %v1791_v27 = vld [vmem:[%s4318_s1 + $0x1d0] sm:$0xff]  ;;  %v1777_v28 = vld [vmem:[%s4318_s1 + $0x160] sm:$0xff]  ;;  %v1776_v30 = vld [vmem:[%s4318_s1 + $0x158] sm:$0xff] }
  0x20   :  { %251 = vmatpush.msra.mxu2 %v1742_v50  ;;  %384 = vmatpush.msrb.mxu1 %v1782_v9  ;;  %v1824_v31 = vld [vmem:[%s4318_s1 + $0x278] sm:$0xff]  ;;  %v1811_v32 = vld [vmem:[%s4318_s1 + $0x210] sm:$0xff]  ;;  %v2534_v34 = vld [vmem:[%s4319_s0 + $0x60] sm:$0xff] }
  0x21   :  { %252 = vmatmul.f32.vlgmr.msra.gmra.mxu2 %v2339_v51  ;;  %123 = vmatpush.msra.mxu0 %v50_v52  ;;  %v1775_v33 = vld [vmem:[%s4318_s1 + $0x150] sm:$0xff]  ;;  %v2541_v35 = vld [vmem:[%s4319_s0 + $0x98] sm:$0xff]  ;;  %v1810_v36 = vld [vmem:[%s4318_s1 + $0x208] sm:$0xff] }
  0x22   :  { %580 = vmatpush.msrb.mxu2 %v1828_v53  ;;  %124 = vmatmul.f32.vlgmr.msra.gmra.mxu0 %v2339_v51  ;;  %v2553_v37 = vld [vmem:[%s4319_s0 + $0x70] sm:$0xff]  ;;  %v2560_v38 = vld [vmem:[%s4319_s0 + $0xa8] sm:$0xff]  ;;  %v1809_v39 = vld [vmem:[%s4318_s1 + $0x200] sm:$0xff] }
  0x23   :  { %1766 = vmatmul.msk.f32.gmra.mxu3 %vm71_vm0, %v2352_v54  ;;  %516 = vmatpush.msrb.mxu0 %v1823_v55  ;;  %v2572_v40 = vld [vmem:[%s4319_s0 + $0x80] sm:$0xff]  ;;  %v1808_v41 = vld [vmem:[%s4318_s1 + $0x1f8] sm:$0xff]  ;;  %v2591_v44 = vld [vmem:[%s4319_s0 + $0x90] sm:$0xff] }
  0x24   :  { %581 = vmatpush.msrb.mxu2 %v1827_v56  ;;  %385 = vmatpush.msrb.mxu1 %v1781_v14  ;;  %v2582_v42 = vld [vmem:[%s4319_s0 + $0xb8] sm:$0xff]  ;;  %v2602_v45 = vld [vmem:[%s4319_s0 + $0xa0] sm:$0xff]  ;;  %v2612_v46 = vld [vmem:[%s4319_s0 + $0xb0] sm:$0xff] }
  0x25   :  { %517 = vmatpush.msrb.mxu0 %v1822_v57  ;;  %444 = vmatpush.msrb.mxu3 %v1791_v27  ;;  %v2753_v13 = vld [vmem:[%s4321_s3 + $0x1d8] sm:$0xff]  ;;  %v2762_v14 = vld [vmem:[%s4321_s3 + $0x68] sm:$0xff] }
  0x26   :  { %582 = vmatpush.msrb.mxu2 %v1826_v61  ;;  %386 = vmatpush.msrb.mxu1 %v1780_v20  ;;  %4369 = vst [vmem:[#allocation4_spill] sm:$0xff] %v2762_v14 }
  0x27   :  { %1733 = vmatmul.msk.f32.gmra.mxu1 %vm71_vm0, %v2352_v54  ;;  %518 = vmatpush.msrb.mxu0 %v1821_v60 }
  0x28   :  { %583 = vmatpush.msrb.mxu2 %v1825_v15  ;;  %387 = vmatpush.msrb.mxu1 %v1779_v22  ;;  %v1878_v15 = vld [vmem:[%s4321_s3 + $0x160] sm:$0xff]  ;;  %v2785_v22 = vld [vmem:[%s4321_s3 + $0x1d0] sm:$0xff] }
  0x29   :  { %255 = vmatmul.f32.gmra.mxu2 %v2382_v62  ;;  %519 = vmatpush.msrb.mxu0 %v1820_v63  ;;  %4370 = vst [vmem:[#allocation5_spill] sm:$0xff] %v2785_v22 }
  0x2a   :  { %127 = vmatmul.f32.gmra.mxu0 %v2382_v62  ;;  %388 = vmatpush.msrb.mxu1 %v1778_v26  ;;  %v2809_v26 = vld [vmem:[%s4321_s3 + $0x1c8] sm:$0xff] }
  0x2b   :  { %1767 = vmatmul.msk.f32.gmra.mxu3 %vm71_vm0, %v2392_v0  ;;  %520 = vmatpush.msrb.mxu0 %v1819_v1  ;;  %4372 = vst [vmem:[#allocation7_spill] sm:$0xff] %v2809_v26 }
  0x2c   :  { %389 = vmatpush.msrb.mxu1 %v1777_v28  ;;  %584 = vmatpush.msrb.mxu2 %v1824_v31 }
  0x2d   :  { %521 = vmatpush.msrb.mxu0 %v1818_v3 }
  0x2e   :  { %390 = vmatpush.msrb.mxu1 %v1776_v30  ;;  %894 = vmatpush.msra.mxu2 %v2753_v13  ;;  %v2820_v30 = vld [vmem:[%s4321_s3 + $0x58] sm:$0xff] }
  0x2f   :  { %1734 = vmatmul.msk.f32.gmra.mxu1 %vm71_vm0, %v2392_v0  ;;  %522 = vmatpush.msrb.mxu0 %v1817_v5  ;;  %4374 = vst [vmem:[#allocation9_spill] sm:$0xff] %v2820_v30 }
  0x30   :  { %391 = vmatpush.msrb.mxu1 %v1775_v33  ;;  %895 = vmatpush.msra.mxu2 %v2785_v22  ;;  %v2830_v33 = vld [vmem:[%s4321_s3 + $0x50] sm:$0xff]  ;;  %v1934_v22 = vld [vmem:[%s4321_s3 + $0x2c0] sm:$0xff] }
  0x31   :  { %258 = vmatmul.f32.gmra.mxu2 %v2416_v6  ;;  %523 = vmatpush.msrb.mxu0 %v1816_v8  ;;  %4376 = vst [vmem:[#allocation11_spill] sm:$0xff] %v2830_v33 }
  0x32   :  { %130 = vmatmul.f32.gmra.mxu0 %v2416_v6  ;;  %896 = vmatpush.msra.mxu2 %v2809_v26 }
  0x33   :  { %1768 = vmatmul.msk.f32.gmra.mxu3 %vm71_vm0, %v2423_v7  ;;  %524 = vmatpush.msrb.mxu0 %v1815_v10 }
  0x35   :  { %525 = vmatpush.msrb.mxu0 %v1814_v16 }
  0x37   :  { %1735 = vmatmul.msk.f32.gmra.mxu1 %vm71_vm0, %v2423_v7  ;;  %526 = vmatpush.msrb.mxu0 %v1813_v21  ;;  %v2780_v21 = vld [vmem:[%s4321_s3 + $0xe0] sm:$0xff] }
  0x39   :  { %261 = vmatmul.f32.gmra.mxu2 %v2441_v11  ;;  %527 = vmatpush.msrb.mxu0 %v1812_v25  ;;  %v2802_v25 = vld [vmem:[%s4321_s3 + $0xd8] sm:$0xff] }
  0x3a   :  { %133 = vmatmul.f32.gmra.mxu0 %v2441_v11 }
  0x3b   :  { %1769 = vmatmul.msk.f32.gmra.mxu3 %vm71_vm0, %v2448_v12  ;;  %528 = vmatpush.msrb.mxu0 %v1811_v32 }
  0x3d   :  { %529 = vmatpush.msrb.mxu0 %v1810_v36  ;;  %v2844_v36 = vld [vmem:[%s4321_s3 + $0x1c0] sm:$0xff] }
  0x3e   :  { %4377 = vst [vmem:[#allocation12_spill] sm:$0xff] %v2844_v36  ;;  %897 = vmatpush.msra.mxu2 %v2844_v36 }
  0x3f   :  { %1736 = vmatmul.msk.f32.gmra.mxu1 %vm71_vm0, %v2448_v12  ;;  %530 = vmatpush.msrb.mxu0 %v1809_v39 }
  0x41   :  { %264 = vmatmul.f32.gmra.mxu2 %v2469_v18  ;;  %531 = vmatpush.msrb.mxu0 %v1808_v41  ;;  %v1875_v41 = vld [vmem:[%s4321_s3 + $0x148] sm:$0xff] }
  0x42   :  { %136 = vmatmul.f32.gmra.mxu0 %v2469_v18 }
  0x43   :  { %1770 = vmatmul.msk.f32.gmra.mxu3 %vm71_vm0, %v2476_v19  ;;  %829 = vmatpush.msra.mxu0 %v1878_v15  ;;  %v1874_v15 = vld [vmem:[%s4321_s3 + $0x140] sm:$0xff] }
  0x47   :  { %1737 = vmatmul.msk.f32.gmra.mxu1 %vm71_vm0, %v2476_v19 }
  0x49   :  { %267 = vmatmul.f32.gmra.mxu2 %v2494_v23 }
  0x4a   :  { %139 = vmatmul.f32.gmra.mxu0 %v2494_v23 }
  0x4b   :  { %1771 = vmatmul.msk.f32.gmra.mxu3 %vm71_vm0, %v2501_v24 }
  0x4f   :  { %1738 = vmatmul.msk.f32.gmra.mxu1 %vm71_vm0, %v2501_v24 }
  0x51   :  { %270 = vmatmul.f32.gmra.mxu2 %v2534_v34 }
  0x52   :  { %142 = vmatmul.f32.gmra.mxu0 %v2534_v34 }
  0x53   :  { %1772 = vmatmul.msk.f32.gmra.mxu3 %vm71_vm0, %v2541_v35 }
  0x57   :  { %1739 = vmatmul.msk.f32.gmra.mxu1 %vm71_vm0, %v2541_v35 }
  0x59   :  { %273 = vmatmul.f32.gmra.mxu2 %v2553_v37 }
  0x5a   :  { %145 = vmatmul.f32.gmra.mxu0 %v2553_v37 }
  0x5b   :  { %1773 = vmatmul.msk.f32.gmra.mxu3 %vm71_vm0, %v2560_v38 }
  0x5f   :  { %1740 = vmatmul.msk.f32.gmra.mxu1 %vm71_vm0, %v2560_v38 }
  0x61   :  { %276 = vmatmul.f32.gmra.mxu2 %v2572_v40 }
  0x62   :  { %148 = vmatmul.f32.gmra.mxu0 %v2572_v40 }
  0x63   :  { %1774 = vmatmul.msk.f32.gmra.mxu3 %vm71_vm0, %v2582_v42 }
  0x67   :  { %1741 = vmatmul.msk.f32.gmra.mxu1 %vm71_vm0, %v2582_v42 }
  0x69   :  { %279 = vmatmul.f32.gmra.mxu2 %v2591_v44 }
  0x6a   :  { %151 = vmatmul.f32.gmra.mxu0 %v2591_v44 }
  0x6b   :  { %1796 = vmatmul.msk.f32.vlgmr.msrb.gmra.mxu3 %vm71_vm0, %v2221_v17 }
  0x6f   :  { %392 = vmatmul.f32.vlgmr.msrb.gmra.mxu1 %v2339_v51 }
  0x71   :  { %282 = vmatmul.f32.gmra.mxu2 %v2602_v45 }
  0x72   :  { %154 = vmatmul.f32.gmra.mxu0 %v2602_v45 }
  0x73   :  { %1797 = vmatmul.msk.f32.gmra.mxu3 %vm71_vm0, %v2263_v29 }
  0x77   :  { %395 = vmatmul.f32.gmra.mxu1 %v2382_v62 }
  0x79   :  { %285 = vmatmul.f32.gmra.mxu2 %v2612_v46 }
  0x7a   :  { %157 = vmatmul.f32.gmra.mxu0 %v2612_v46 }
  0x7b   :  { %1798 = vmatmul.msk.f32.gmra.mxu3 %vm71_vm0, %v2311_v43 }
  0x7f   :  { %398 = vmatmul.f32.gmra.mxu1 %v2416_v6 }
  0x81   :  { %1829 = vmatmul.msk.f32.vlgmr.msrb.gmra.mxu2 %vm71_vm0, %v2221_v17 }
  0x82   :  { %532 = vmatmul.f32.vlgmr.msrb.gmra.mxu0 %v2339_v51 }
  0x83   :  { %1799 = vmatmul.msk.f32.gmra.mxu3 %vm71_vm0, %v2352_v54 }
  0x87   :  { %401 = vmatmul.f32.gmra.mxu1 %v2441_v11 }
  0x89   :  { %1830 = vmatmul.msk.f32.gmra.mxu2 %vm71_vm0, %v2263_v29 }
  0x8a   :  { %535 = vmatmul.f32.gmra.mxu0 %v2382_v62 }
  0x8b   :  { %1800 = vmatmul.msk.f32.gmra.mxu3 %vm71_vm0, %v2392_v0 }
  0x8c   :  { %v2631_v47 = vpop.f32.mrf.mxu1 }
  0x8e   :  { %v2633_v48 = vpop.f32.mrf.mxu3 }
  0x8f   :  { %404 = vmatmul.f32.gmra.mxu1 %v2469_v18 }
  0x91   :  { %1831 = vmatmul.msk.f32.gmra.mxu2 %vm71_vm0, %v2311_v43 }
  0x92   :  { %538 = vmatmul.f32.gmra.mxu0 %v2416_v6 }
  0x93   :  { %1801 = vmatmul.msk.f32.gmra.mxu3 %vm71_vm0, %v2423_v7 }
  0x94   :  { %v2641_v17 = vpop.f32.mrf.mxu1 }
  0x96   :  { %v2643_v29 = vpop.f32.mrf.mxu3 }
  0x97   :  { %407 = vmatmul.f32.gmra.mxu1 %v2494_v23 }
  0x99   :  { %1832 = vmatmul.msk.f32.gmra.mxu2 %vm71_vm0, %v2352_v54 }
  0x9a   :  { %541 = vmatmul.f32.gmra.mxu0 %v2441_v11 }
  0x9b   :  { %1802 = vmatmul.msk.f32.gmra.mxu3 %vm71_vm0, %v2448_v12 }
  0x9c   :  { %v2651_v43 = vpop.f32.mrf.mxu1 }
  0x9e   :  { %v2653_v49 = vpop.f32.mrf.mxu3 }
  0x9f   :  { %410 = vmatmul.f32.gmra.mxu1 %v2534_v34  ;;  %v2656_v50 = vpop.f32.mrf.mxu0 }
  0xa1   :  { %1833 = vmatmul.msk.f32.gmra.mxu2 %vm71_vm0, %v2392_v0 }
  0xa2   :  { %544 = vmatmul.f32.gmra.mxu0 %v2469_v18 }
  0xa3   :  { %1803 = vmatmul.msk.f32.gmra.mxu3 %vm71_vm0, %v2476_v19 }
  0xa4   :  { %v2663_v51 = vpop.f32.mrf.mxu2  ;;  %v2665_v52 = vpop.f32.mrf.mxu1 }
  0xa5   :  { %v307_v26 = vadd.f32 %v2633_v48, %v2663_v51  ;;  %v1933_v48 = vld [vmem:[%s4321_s3 + $0x2b8] sm:$0xff] }
  0xa6   :  { %v2667_v53 = vpop.f32.mrf.mxu3 }
  0xa7   :  { %413 = vmatmul.f32.gmra.mxu1 %v2553_v37  ;;  %v2670_v54 = vpop.f32.mrf.mxu0 }
  0xa9   :  { %1834 = vmatmul.msk.f32.gmra.mxu2 %vm71_vm0, %v2423_v7  ;;  %v2731_v7 = vld [vmem:[%s4321_s3 + $0x70] sm:$0xff] }
  0xaa   :  { %547 = vmatmul.f32.gmra.mxu0 %v2494_v23  ;;  %4368 = vst [vmem:[#allocation3_spill] sm:$0xff] %v2731_v7  ;;  %768 = vmatpush.msra.mxu3 %v2731_v7  ;;  %v2794_v23 = vld [vmem:[%s4321_s3 + $0x60] sm:$0xff] }
  0xab   :  { %1804 = vmatmul.msk.f32.gmra.mxu3 %vm71_vm0, %v2501_v24  ;;  %4371 = vst [vmem:[#allocation6_spill] sm:$0xff] %v2794_v23 }
  0xac   :  { %v2677_v55 = vpop.f32.mrf.mxu2  ;;  %v2679_v56 = vpop.f32.mrf.mxu1  ;;  %769 = vmatpush.msra.mxu3 %v2762_v14 }
  0xae   :  { %v2681_v57 = vpop.f32.mrf.mxu3  ;;  %770 = vmatpush.msra.mxu3 %v2794_v23  ;;  %v680_v23 = vld [vmem:[%s4321_s3 + $0x8] sm:$0xff] }
  0xaf   :  { %416 = vmatmul.f32.gmra.mxu1 %v2572_v40  ;;  %v2684_v58 = vpop.f32.mrf.mxu0 }
  0xb0   :  { %771 = vmatpush.msra.mxu3 %v2820_v30  ;;  %v1870_v30 = vld [vmem:[%s4321_s3 + $0x120] sm:$0xff] }
  0xb1   :  { %1835 = vmatmul.msk.f32.gmra.mxu2 %vm71_vm0, %v2448_v12  ;;  %v2748_v12 = vld [vmem:[%s4321_s3 + $0xe8] sm:$0xff] }
  0xb2   :  { %550 = vmatmul.f32.gmra.mxu0 %v2534_v34  ;;  %727 = vmatpush.msra.mxu1 %v2748_v12  ;;  %v1876_v34 = vld [vmem:[%s4321_s3 + $0x150] sm:$0xff] }
  0xb3   :  { %1805 = vmatmul.msk.f32.gmra.mxu3 %vm71_vm0, %v2541_v35 }
  0xb4   :  { %v2691_v59 = vpop.f32.mrf.mxu2  ;;  %v2693_v60 = vpop.f32.mrf.mxu1  ;;  %728 = vmatpush.msra.mxu1 %v2780_v21  ;;  %772 = vmatpush.msra.mxu3 %v2830_v33 }
  0xb6   :  { %v2695_v61 = vpop.f32.mrf.mxu3  ;;  %729 = vmatpush.msra.mxu1 %v2802_v25 }
  0xb7   :  { %419 = vmatmul.f32.gmra.mxu1 %v2591_v44  ;;  %v2698_v62 = vpop.f32.mrf.mxu0 }
  0xb9   :  { %1836 = vmatmul.msk.f32.gmra.mxu2 %vm71_vm0, %v2476_v19 }
  0xba   :  { %553 = vmatmul.f32.gmra.mxu0 %v2553_v37  ;;  %v2850_v37 = vld [vmem:[%s4321_s3 + $0x48] sm:$0xff] }
  0xbb   :  { %1806 = vmatmul.msk.f32.gmra.mxu3 %vm71_vm0, %v2560_v38  ;;  %4378 = vst [vmem:[#allocation13_spill] sm:$0xff] %v2850_v37 }
  0xbc   :  { %v2705_v63 = vpop.f32.mrf.mxu2  ;;  %v2707_v0 = vpop.f32.mrf.mxu1  ;;  %773 = vmatpush.msra.mxu3 %v2850_v37 }
  0xbe   :  { %v2709_v1 = vpop.f32.mrf.mxu3 }
  0xbf   :  { %422 = vmatmul.f32.gmra.mxu1 %v2602_v45  ;;  %v2712_v2 = vpop.f32.mrf.mxu0 }
  0xc1   :  { %1837 = vmatmul.msk.f32.gmra.mxu2 %vm71_vm0, %v2501_v24  ;;  %v1877_v24 = vld [vmem:[%s4321_s3 + $0x158] sm:$0xff] }
  0xc2   :  { %556 = vmatmul.f32.gmra.mxu0 %v2572_v40 }
  0xc3   :  { %1807 = vmatmul.msk.f32.gmra.mxu3 %vm71_vm0, %v2582_v42  ;;  %830 = vmatpush.msra.mxu0 %v1877_v24  ;;  %v684_v24 = vld [vmem:[%s4321_s3 + $0x28] sm:$0xff] }
  0xc4   :  { %v2719_v3 = vpop.f32.mrf.mxu2  ;;  %v2721_v4 = vpop.f32.mrf.mxu1 }
  0xc5   :  { %831 = vmatpush.msra.mxu0 %v1876_v34  ;;  %v1873_v34 = vld [vmem:[%s4321_s3 + $0x138] sm:$0xff] }
  0xc6   :  { %v2723_v5 = vpop.f32.mrf.mxu3 }
  0xc7   :  { %425 = vmatmul.f32.gmra.mxu1 %v2612_v46  ;;  %v2726_v6 = vpop.f32.mrf.mxu0  ;;  %832 = vmatpush.msra.mxu0 %v1875_v41  ;;  %v683_v41 = vld [vmem:[%s4321_s3 + $0x20] sm:$0xff] }
  0xc9   :  { %1838 = vmatmul.msk.f32.gmra.mxu2 %vm71_vm0, %v2541_v35  ;;  %v2839_v35 = vld [vmem:[%s4321_s3 + $0xd0] sm:$0xff]  ;;  %833 = vmatpush.msra.mxu0 %v1874_v15 }
  0xca   :  { %559 = vmatmul.f32.gmra.mxu0 %v2591_v44  ;;  %730 = vmatpush.msra.mxu1 %v2839_v35 }
  0xcb   :  { %834 = vmatpush.msra.mxu0 %v1873_v34  ;;  %v682_v34 = vld [vmem:[%s4321_s3 + $0x18] sm:$0xff] }
  0xcc   :  { %v2737_v8 = vpop.f32.mrf.mxu2  ;;  %v2739_v9 = vpop.f32.mrf.mxu1 }
  0xce   :  { %v2741_v10 = vpop.f32.mrf.mxu3 }
  0xcf   :  { %v2743_v11 = vpop.f32.mrf.mxu0 }
  0xd1   :  { %1839 = vmatmul.msk.f32.gmra.mxu2 %vm71_vm0, %v2560_v38  ;;  %v2857_v38 = vld [vmem:[%s4321_s3 + $0x40] sm:$0xff] }
  0xd2   :  { %562 = vmatmul.f32.gmra.mxu0 %v2602_v45  ;;  %4379 = vst [vmem:[#allocation14_spill] sm:$0xff] %v2857_v38  ;;  %774 = vmatpush.msra.mxu3 %v2857_v38  ;;  %v2897_v38 = vld [vmem:[%s4321_s3 + $0xc8] sm:$0xff] }
  0xd3   :  { %731 = vmatpush.msra.mxu1 %v2897_v38 }
  0xd4   :  { %v2769_v16 = vpop.f32.mrf.mxu2  ;;  %v2771_v18 = vpop.f32.mrf.mxu1 }
  0xd6   :  { %v2773_v19 = vpop.f32.mrf.mxu3 }
  0xd7   :  { %v2775_v20 = vpop.f32.mrf.mxu0 }
  0xd9   :  { %1840 = vmatmul.msk.f32.gmra.mxu2 %vm71_vm0, %v2582_v42  ;;  %v686_v42 = vld [vmem:[%s4321_s3 + $0x38] sm:$0xff] }
  0xda   :  { %565 = vmatmul.f32.gmra.mxu0 %v2612_v46  ;;  %775 = vmatpush.msra.mxu3 %v686_v42  ;;  %v685_v46 = vld [vmem:[%s4321_s3 + $0x30] sm:$0xff] }
  0xdb   :  { %v1872_v42 = vld [vmem:[%s4321_s3 + $0x130] sm:$0xff] }
  0xdc   :  { %v2812_v27 = vpop.f32.mrf.mxu2  ;;  %v2814_v28 = vpop.f32.mrf.mxu1  ;;  %776 = vmatpush.msra.mxu3 %v685_v46  ;;  %835 = vmatpush.msra.mxu0 %v1872_v42  ;;  %v1871_v42 = vld [vmem:[%s4321_s3 + $0x128] sm:$0xff] }
  0xdd   :  { %4373 = vst [vmem:[#allocation8_spill] sm:$0xff] %v2814_v28 }
  0xde   :  { %v2822_v31 = vpop.f32.mrf.mxu3  ;;  %777 = vmatpush.msra.mxu3 %v684_v24  ;;  %v2902_v24 = vld [vmem:[%s4321_s3 + $0x1b8] sm:$0xff]  ;;  %836 = vmatpush.msra.mxu0 %v1871_v42  ;;  %v1868_v42 = vld [vmem:[%s4321_s3 + $0x110] sm:$0xff] }
  0xdf   :  { %4375 = vst [vmem:[#allocation10_spill] sm:$0xff] %v2822_v31  ;;  %v2825_v32 = vpop.f32.mrf.mxu0  ;;  %898 = vmatpush.msra.mxu2 %v2902_v24 }
  0xe0   :  { %4382 = vst [vmem:[#allocation17_spill] sm:$0xff] %v2902_v24  ;;  %778 = vmatpush.msra.mxu3 %v683_v41  ;;  %v681_v41 = vld [vmem:[%s4321_s3 + $0x10] sm:$0xff]  ;;  %837 = vmatpush.msra.mxu0 %v1870_v30  ;;  %v1869_v24 = vld [vmem:[%s4321_s3 + $0x118] sm:$0xff] }
  0xe2   :  { %779 = vmatpush.msra.mxu3 %v682_v34  ;;  %838 = vmatpush.msra.mxu0 %v1869_v24  ;;  %v679_v34 = vld [vmem:[%s4321_s3] sm:$0xff]  ;;  %v1867_v24 = vld [vmem:[%s4321_s3 + $0x108] sm:$0xff] }
  0xe4   :  { %v2859_v39 = vpop.f32.mrf.mxu2  ;;  %v2861_v40 = vpop.f32.mrf.mxu1  ;;  %780 = vmatpush.msra.mxu3 %v681_v41  ;;  %839 = vmatpush.msra.mxu0 %v1868_v42  ;;  %v1864_v42 = vld [vmem:[%s4321_s3 + $0xf0] sm:$0xff] }
  0xe5   :  { %4380 = vst [vmem:[#allocation15_spill] sm:$0xff] %v2861_v40  ;;  %v2937_v40 = vld [vmem:[%s4321_s3 + $0xc0] sm:$0xff] }
  0xe6   :  { %v2870_v44 = vpop.f32.mrf.mxu3  ;;  %781 = vmatpush.msra.mxu3 %v680_v23  ;;  %v2942_v23 = vld [vmem:[%s4321_s3 + $0x1b0] sm:$0xff]  ;;  %732 = vmatpush.msra.mxu1 %v2937_v40 }
  0xe7   :  { %4381 = vst [vmem:[#allocation16_spill] sm:$0xff] %v2870_v44  ;;  %v2872_v45 = vpop.f32.mrf.mxu0  ;;  %899 = vmatpush.msra.mxu2 %v2942_v23  ;;  %840 = vmatpush.msra.mxu0 %v1867_v24  ;;  %v1866_v44 = vld [vmem:[%s4321_s3 + $0x100] sm:$0xff]  ;;  %v2967_v24 = vld [vmem:[%s4321_s3 + $0xb8] sm:$0xff] }
  0xe8   :  { %4385 = vst [vmem:[#allocation20_spill] sm:$0xff] %v2942_v23  ;;  %782 = vmatpush.msra.mxu3 %v679_v34  ;;  %v1865_v34 = vld [vmem:[%s4321_s3 + $0xf8] sm:$0xff]  ;;  %733 = vmatpush.msra.mxu1 %v2967_v24 }
  0xe9   :  { %841 = vmatpush.msra.mxu0 %v1866_v44  ;;  %v2972_v44 = vld [vmem:[%s4321_s3 + $0x1a8] sm:$0xff] }
  0xea   :  { %4388 = vst [vmem:[#allocation23_spill] sm:$0xff] %v2972_v44  ;;  %900 = vmatpush.msra.mxu2 %v2972_v44 }
  0xeb   :  { %842 = vmatpush.msra.mxu0 %v1865_v34  ;;  %v2977_v34 = vld [vmem:[%s4321_s3 + $0xb0] sm:$0xff] }
  0xec   :  { %v2892_v15 = vpop.f32.mrf.mxu2  ;;  %v393_v46 = vpop.f32.mrf.mxu1  ;;  %734 = vmatpush.msra.mxu1 %v2977_v34 }
  0xed   :  { %843 = vmatpush.msra.mxu0 %v1864_v42  ;;  %v179_v42 = vadd.f32 %v2631_v47, %v2656_v50 }
  0xee   :  { %v446_v37 = vpop.f32.mrf.mxu3 }
  0xef   :  { %v2912_v33 = vpop.f32.mrf.mxu0  ;;  %v447_v44 = vadd.f32 %v446_v37, %v393_v46  ;;  %v342_v31 = vmax.f32 %v179_v42, %v307_v26  ;;  %v1932_v26 = vld [vmem:[%s4321_s3 + $0x2b0] sm:$0xff]  ;;  %v1931_v42 = vld [vmem:[%s4321_s3 + $0x2a8] sm:$0xff] }
  0xf0   :  { %4383 = vst [vmem:[#allocation18_spill] sm:$0xff] %v2912_v33  ;;  %v1935_v33 = vld [vmem:[%s4321_s3 + $0x2c8] sm:$0xff] }
  0xf1   :  { %1053 = vmatpush.msrb.mxu0 %v1935_v33  ;;  %v3013_v33 = vld [vmem:[%s4321_s3 + $0xa8] sm:$0xff] }
  0xf2   :  { %735 = vmatpush.msra.mxu1 %v3013_v33 }
  0xf3   :  { %1054 = vmatpush.msrb.mxu0 %v1934_v22  ;;  %v3018_v22 = vld [vmem:[%s4321_s3 + $0x198] sm:$0xff] }
  0xf4   :  { %v2932_v41 = vpop.f32.mrf.mxu2  ;;  %v396_v30 = vpop.f32.mrf.mxu1 }
  0xf5   :  { %4384 = vst [vmem:[#allocation19_spill] sm:$0xff] %v2932_v41  ;;  %v482_v41 = vmax.f32 %v342_v31, %v447_v44  ;;  %1055 = vmatpush.msrb.mxu0 %v1933_v48  ;;  %v3032_v44 = vld [vmem:[%s4321_s3 + $0x340] sm:$0xff]  ;;  %v182_v48 = vadd.f32 %v2641_v17, %v2670_v54  ;;  %v3053_v17 = vld [vmem:[%s4321_s3 + $0x330] sm:$0xff]  ;;  %v1929_v54 = vld [vmem:[%s4321_s3 + $0x298] sm:$0xff] }
  0xf6   :  { %v449_v14 = vpop.f32.mrf.mxu3  ;;  %1024 = vmatpush.msrb.mxu3 %v3032_v44  ;;  %4390 = vst [vmem:[#allocation25_spill] sm:$0xff] %v3053_v17 }
  0xf7   :  { %v2949_v36 = vpop.f32.mrf.mxu0  ;;  %1056 = vmatpush.msrb.mxu0 %v1932_v26 }
  0xf8   :  { %4386 = vst [vmem:[#allocation21_spill] sm:$0xff] %v2949_v36 }
  0xf9   :  { %1057 = vmatpush.msrb.mxu0 %v1931_v42  ;;  %v3068_v42 = vld [vmem:[%s4321_s3 + $0x190] sm:$0xff] }
  0xfc   :  { %v2960_v7 = vpop.f32.mrf.mxu2  ;;  %v2962_v23 = vpop.f32.mrf.mxu1 }
  0xfd   :  { %4387 = vst [vmem:[#allocation22_spill] sm:$0xff] %v2960_v7  ;;  %v2986_v7 = vld [vmem:[%s4321_s3 + $0x1a0] sm:$0xff] }
  0xfe   :  { %v2979_v36 = vpop.f32.mrf.mxu3  ;;  %4389 = vst [vmem:[#allocation24_spill] sm:$0xff] %v2986_v7  ;;  %901 = vmatpush.msra.mxu2 %v2986_v7  ;;  %v3006_v7 = vld [vmem:[%s4320_s2] ss:$0 sm:$0xff] }
  0xff   :  { %v533_v28 = vpop.f32.mrf.mxu0 }
 0x100   :  { %902 = vmatpush.msra.mxu2 %v3018_v22 }
 0x102   :  { %903 = vmatpush.msra.mxu2 %v3068_v42 }
 0x104   :  { %v586_v51 = vpop.f32.mrf.mxu2  ;;  %v3008_v50 = vpop.f32.mrf.mxu1 }
 0x105   :  { %v587_v47 = vadd.f32 %v586_v51, %v533_v28  ;;  %v310_v28 = vadd.f32 %v2643_v29, %v2677_v55  ;;  %v450_v51 = vadd.f32 %v449_v14, %v396_v30  ;;  %v3044_v55 = vld [vmem:[%s4321_s3 + $0x338] sm:$0xff] }
 0x106   :  { %v3023_v37 = vpop.f32.mrf.mxu3  ;;  %1025 = vmatpush.msrb.mxu3 %v3044_v55 }
 0x107   :  { %v622_v31 = vmax.f32 %v482_v41, %v587_v47  ;;  %v536_v46 = vpop.f32.mrf.mxu0  ;;  %v1930_v41 = vld [vmem:[%s4321_s3 + $0x2a0] sm:$0xff]  ;;  %v343_v47 = vmax.f32 %v182_v48, %v310_v28  ;;  %v3073_v48 = vld [vmem:[%s4321_s3 + $0x328] sm:$0xff] }
 0x108   :  { %1058 = vmatpush.msrb.mxu0 %v1930_v41  ;;  %1026 = vmatpush.msrb.mxu3 %v3053_v17  ;;  %v3063_v28 = vld [vmem:[%s4321_s3 + $0xa0] sm:$0xff]  ;;  %4391 = vst [vmem:[#allocation26_spill] sm:$0xff] %v3073_v48 }
 0x109   :  { %v638_v29 = vadd.f32 %v3006_v7, %v622_v31  ;;  %v483_v30 = vmax.f32 %v343_v47, %v450_v51  ;;  %736 = vmatpush.msra.mxu1 %v3063_v28  ;;  %v313_v51 = vadd.f32 %v2653_v49, %v2691_v59  ;;  %v185_v49 = vadd.f32 %v2651_v43, %v2684_v58  ;;  %v1925_v43 = vld [vmem:[%s4321_s3 + $0x278] sm:$0xff] }
 0x10a   :  { %1059 = vmatpush.msrb.mxu0 %v1929_v54  ;;  %1027 = vmatpush.msrb.mxu3 %v3073_v48  ;;  %v1927_v54 = vld [vmem:[%s4321_s3 + $0x288] sm:$0xff]  ;;  %v453_v59 = vadd.f32 %v2979_v36, %v2962_v23  ;;  %v3118_v23 = vld [vmem:[%s4321_s3 + $0x310] sm:$0xff] }
 0x10b   :  { %v650_v26 = vmax.f32 %v638_v29, 0.0  ;;  %v344_v48 = vmax.f32 %v185_v49, %v313_v51  ;;  %4392 = vst [vmem:[#allocation27_spill] sm:$0xff] %v3118_v23  ;;  %v3131_v49 = vld [vmem:[%s4321_s3 + $0x188] sm:$0xff] }
 0x10c   :  { %v589_v14 = vpop.f32.mrf.mxu2  ;;  %v3082_v41 = vpop.f32.mrf.mxu1  ;;  %904 = vmatpush.msra.mxu2 %v3131_v49 }
 0x10d   :  { %663 = vst.msk [vmem:[#allocation2] sm:$0xff] %vm662_vm1, %v650_v26  ;;  %v590_v31 = vadd.f32 %v589_v14, %v536_v46  ;;  %v1928_v46 = vld [vmem:[%s4321_s3 + $0x290] sm:$0xff]  ;;  %v3088_v26 = vld [vmem:[%s4321_s3 + $0x320] sm:$0xff] }
 0x10e   :  { %1060 = vmatpush.msrb.mxu0 %v1928_v46  ;;  %v3093_v14 = vpop.f32.mrf.mxu3  ;;  %1028 = vmatpush.msrb.mxu3 %v3088_v26  ;;  %v1926_v46 = vld [vmem:[%s4321_s3 + $0x280] sm:$0xff] }
 0x10f   :  { %v623_v29 = vmax.f32 %v483_v30, %v590_v31  ;;  %v539_v47 = vpop.f32.mrf.mxu0  ;;  %v3104_v31 = vld [vmem:[%s4321_s3 + $0x318] sm:$0xff] }
 0x110   :  { %1061 = vmatpush.msrb.mxu0 %v1927_v54  ;;  %1029 = vmatpush.msrb.mxu3 %v3104_v31  ;;  %v3126_v54 = vld [vmem:[%s4321_s3 + $0x98] sm:$0xff] }
 0x111   :  { %v639_v30 = vadd.f32 %v3006_v7, %v623_v29  ;;  %v484_v29 = vmax.f32 %v344_v48, %v453_v59  ;;  %737 = vmatpush.msra.mxu1 %v3126_v54  ;;  %v3143_v48 = vld [vmem:[%s4321_s3 + $0x270] sm:$0xff] }
 0x112   :  { %1062 = vmatpush.msrb.mxu0 %v1926_v46  ;;  %4394 = vst [vmem:[#allocation29_spill] sm:$0xff] %v3143_v48  ;;  %1030 = vmatpush.msrb.mxu3 %v3118_v23  ;;  %v3152_v46 = vld [vmem:[%s4321_s3 + $0x268] sm:$0xff] }
 0x113   :  { %v651_v17 = vmax.f32 %v639_v30, 0.0  ;;  %4395 = vst [vmem:[#allocation30_spill] sm:$0xff] %v3152_v46 }
 0x114   :  { %v592_v58 = vpop.f32.mrf.mxu2  ;;  %v3113_v36 = vld [vmem:[#allocation2] sm:$0xff]  ;;  %1063 = vmatpush.msrb.mxu0 %v1925_v43 }
 0x115   :  { %664 = vst.msk [vmem:[#allocation2 + $0x8] sm:$0xff] %vm662_vm1, %v651_v17  ;;  %v593_v51 = vadd.f32 %v592_v58, %v539_v47  ;;  %1860 = vmatmul.msk.f32.vlgmr.msra.gmra.mxu3 %vm662_vm1, %v3113_v36  ;;  %v3138_v17 = vld [vmem:[%s4321_s3 + $0x308] sm:$0xff]  ;;  %v316_v47 = vadd.f32 %v2667_v53, %v2705_v63  ;;  %v3157_v43 = vld [vmem:[%s4321_s3 + $0x300] sm:$0xff]  ;;  %v188_v58 = vadd.f32 %v2665_v52, %v2698_v62 }
 0x116   :  { %4393 = vst [vmem:[#allocation28_spill] sm:$0xff] %v3138_v17  ;;  %1064 = vmatpush.msrb.mxu0 %v3143_v48  ;;  %v456_v53 = vadd.f32 %v3023_v37, %v3008_v50  ;;  %1031 = vmatpush.msrb.mxu3 %v3138_v17  ;;  %v3173_v48 = vpop.f32.mrf.mxu3  ;;  %v3182_v37 = vld [vmem:[%s4321_s3 + $0x2f8] sm:$0xff]  ;;  %v191_v17 = vadd.f32 %v2679_v56, %v2712_v2  ;;  %v3251_v56 = vld [vmem:[%s4321_s3 + $0x2e0] sm:$0xff] }
 0x117   :  { %v624_v59 = vmax.f32 %v484_v29, %v593_v51  ;;  %v542_v30 = vpop.f32.mrf.mxu0  ;;  %4396 = vst [vmem:[#allocation31_spill] sm:$0xff] %v3157_v43  ;;  %v3164_v29 = vpop.f32.mrf.mxu1  ;;  %v3171_v51 = vld [vmem:[%s4321_s3 + $0x260] sm:$0xff]  ;;  %v345_v23 = vmax.f32 %v188_v58, %v316_v47  ;;  %v3197_v58 = vld [vmem:[%s4321_s3 + $0x90] sm:$0xff]  ;;  %v3257_v2 = vld [vmem:[%s4321_s3 + $0x78] sm:$0xff] }
 0x118   :  { %1065 = vmatpush.msrb.mxu0 %v3152_v46  ;;  %4397 = vst [vmem:[#allocation32_spill] sm:$0xff] %v3171_v51  ;;  %1032 = vmatpush.msrb.mxu3 %v3157_v43  ;;  %v3230_v43 = vld [vmem:[%s4321_s3 + $0x2e8] sm:$0xff] }
 0x119   :  { %v640_v63 = vadd.f32 %v3006_v7, %v624_v59  ;;  %4398 = vst [vmem:[#allocation33_spill] sm:$0xff] %v3182_v37  ;;  %v3187_v59 = vld [vmem:[%s4321_s3 + $0x258] sm:$0xff]  ;;  %v485_v46 = vmax.f32 %v345_v23, %v456_v53  ;;  %v3207_v23 = vld [vmem:[%s4321_s3 + $0x88] sm:$0xff]  ;;  %738 = vmatpush.msra.mxu1 %v3197_v58  ;;  %v3219_v53 = vld [vmem:[%s4321_s3 + $0x2f0] sm:$0xff] }
 0x11a   :  { %1066 = vmatpush.msrb.mxu0 %v3171_v51  ;;  %4399 = vst [vmem:[#allocation34_spill] sm:$0xff] %v3187_v59  ;;  %1033 = vmatpush.msrb.mxu3 %v3182_v37 }
 0x11b   :  { %v652_v52 = vmax.f32 %v640_v63, 0.0  ;;  %v3202_v63 = vld [vmem:[%s4321_s3 + $0x180] sm:$0xff]  ;;  %739 = vmatpush.msra.mxu1 %v3207_v23  ;;  %4400 = vst [vmem:[#allocation35_spill] sm:$0xff] %v3251_v56 }
 0x11c   :  { %v595_v62 = vpop.f32.mrf.mxu2  ;;  %v3177_v50 = vld [vmem:[#allocation2 + $0x8] sm:$0xff]  ;;  %905 = vmatpush.msra.mxu2 %v3202_v63  ;;  %1067 = vmatpush.msrb.mxu0 %v3187_v59 }
 0x11d   :  { %665 = vst.msk [vmem:[#allocation2 + $0x10] sm:$0xff] %vm662_vm1, %v652_v52  ;;  %v596_v47 = vadd.f32 %v595_v62, %v542_v30  ;;  %1861 = vmatmul.msk.f32.gmra.mxu3 %vm662_vm1, %v3177_v50  ;;  %1879 = vmatmul.msk.f32.vlgmr.msra.gmra.mxu0 %vm662_vm1, %v3177_v50  ;;  %v3214_v30 = vld [vmem:[%s4321_s3 + $0x178] sm:$0xff]  ;;  %v319_v52 = vadd.f32 %v2681_v57, %v2719_v3 }
 0x11e   :  { %906 = vmatpush.msra.mxu2 %v3214_v30  ;;  %v459_v57 = vadd.f32 %v3093_v14, %v3082_v41  ;;  %1034 = vmatpush.msrb.mxu3 %v3219_v53 }
 0x11f   :  { %v625_v62 = vmax.f32 %v485_v46, %v596_v47  ;;  %v545_v51 = vpop.f32.mrf.mxu0  ;;  %1233 = vmatpush.msra.mxu0 %v2748_v12  ;;  %v3242_v46 = vld [vmem:[%s4321_s3 + $0x80] sm:$0xff]  ;;  %v346_v47 = vmax.f32 %v191_v17, %v319_v52  ;;  %v3245_v37 = vpop.f32.mrf.mxu1 }
 0x120   :  { %740 = vmatpush.msra.mxu1 %v3242_v46  ;;  %1035 = vmatpush.msrb.mxu3 %v3230_v43  ;;  %v464_v12 = vpop.f32.mrf.mxu3 }
 0x121   :  { %v641_v3 = vadd.f32 %v3006_v7, %v625_v62  ;;  %1234 = vmatpush.msra.mxu0 %v2780_v21  ;;  %v486_v17 = vmax.f32 %v346_v47, %v459_v57  ;;  %v3270_v21 = vld [vmem:[%s4321_s3 + $0x170] sm:$0xff]  ;;  %v3275_v62 = vld [vmem:[%s4321_s3 + $0x2d8] sm:$0xff] }
 0x122   :  { %741 = vmatpush.msra.mxu1 %v3257_v2  ;;  %4401 = vst [vmem:[#allocation36_spill] sm:$0xff] %v3275_v62  ;;  %1036 = vmatpush.msrb.mxu3 %v3251_v56  ;;  %v3291_v47 = vld [vmem:[%s4321_s3 + $0x250] sm:$0xff] }
 0x123   :  { %v653_v59 = vmax.f32 %v641_v3, 0.0  ;;  %907 = vmatpush.msra.mxu2 %v3270_v21  ;;  %v3284_v3 = vld [vmem:[%s4321_s3 + $0x2d0] sm:$0xff]  ;;  %1235 = vmatpush.msra.mxu0 %v2802_v25 }
 0x124   :  { %v598_v41 = vpop.f32.mrf.mxu2  ;;  %v3259_v14 = vld [vmem:[#allocation2 + $0x10] sm:$0xff]  ;;  %4402 = vst [vmem:[#allocation37_spill] sm:$0xff] %v3284_v3  ;;  %1037 = vmatpush.msrb.mxu3 %v3275_v62  ;;  %959 = vmatpush.msrb.mxu1 %v3291_v47 }
 0x125   :  { %666 = vst.msk [vmem:[#allocation2 + $0x18] sm:$0xff] %vm662_vm1, %v653_v59  ;;  %v599_v52 = vadd.f32 %v598_v41, %v545_v51  ;;  %1862 = vmatmul.msk.f32.gmra.mxu3 %vm662_vm1, %v3259_v14  ;;  %1880 = vmatmul.msk.f32.gmra.mxu0 %vm662_vm1, %v3259_v14  ;;  %v322_v51 = vadd.f32 %v2695_v61, %v2737_v8  ;;  %v3296_v61 = vld [vmem:[%s4321_s3 + $0x4a8] sm:$0xff] }
 0x126   :  { %4403 = vst [vmem:[#allocation38_spill] sm:$0xff] %v3296_v61  ;;  %v194_v8 = vadd.f32 %v2693_v60, %v2726_v6  ;;  %v462_v41 = vadd.f32 %v3173_v48, %v3164_v29  ;;  %1236 = vmatpush.msra.mxu0 %v2839_v35  ;;  %1038 = vmatpush.msrb.mxu3 %v3284_v3  ;;  %v3316_v60 = vld [vmem:[%s4321_s3 + $0x4a0] sm:$0xff]  ;;  %v3323_v48 = vld [vmem:[%s4321_s3 + $0x168] sm:$0xff] }
 0x127   :  { %v626_v59 = vmax.f32 %v486_v17, %v599_v52  ;;  %v548_v57 = vpop.f32.mrf.mxu0  ;;  %v3309_v17 = vld [vmem:[%s4321_s3 + $0x248] sm:$0xff]  ;;  %4404 = vst [vmem:[#allocation39_spill] sm:$0xff] %v3316_v60  ;;  %v3329_v29 = vld [vmem:[%s4321_s3 + $0x240] sm:$0xff]  ;;  %908 = vmatpush.msra.mxu2 %v3323_v48 }
 0x128   :  { %v347_v52 = vmax.f32 %v194_v8, %v322_v51  ;;  %1196 = vmatpush.msra.mxu3 %v3296_v61  ;;  %1237 = vmatpush.msra.mxu0 %v2897_v38  ;;  %v414_v51 = vpop.f32.mrf.mxu1  ;;  %v3339_v8 = vld [vmem:[%s4321_s3 + $0x498] sm:$0xff] }
 0x129   :  { %v642_v25 = vadd.f32 %v3006_v7, %v626_v59  ;;  %960 = vmatpush.msrb.mxu1 %v3309_v17  ;;  %4405 = vst [vmem:[#allocation40_spill] sm:$0xff] %v3339_v8 }
 0x12a   :  { %v487_v38 = vmax.f32 %v347_v52, %v462_v41  ;;  %1197 = vmatpush.msra.mxu3 %v3316_v60  ;;  %1238 = vmatpush.msra.mxu0 %v2937_v40  ;;  %v3350_v52 = vld [vmem:[%s4321_s3 + $0x238] sm:$0xff]  ;;  %v465_v40 = vadd.f32 %v464_v12, %v3245_v37  ;;  %v3391_v37 = vld [vmem:[%s4321_s3 + $0x228] sm:$0xff] }
 0x12b   :  { %v654_v62 = vmax.f32 %v642_v25, 0.0  ;;  %v467_v25 = vpop.f32.mrf.mxu3  ;;  %961 = vmatpush.msrb.mxu1 %v3329_v29 }
 0x12c   :  { %v601_v6 = vpop.f32.mrf.mxu2  ;;  %v3318_v35 = vld [vmem:[#allocation2 + $0x18] sm:$0xff]  ;;  %1198 = vmatpush.msra.mxu3 %v3339_v8  ;;  %1239 = vmatpush.msra.mxu0 %v2967_v24  ;;  %v3377_v8 = vld [vmem:[%s4321_s3 + $0x488] sm:$0xff] }
 0x12d   :  { %667 = vst.msk [vmem:[#allocation2 + $0x20] sm:$0xff] %vm662_vm1, %v654_v62  ;;  %v602_v59 = vadd.f32 %v601_v6, %v548_v57  ;;  %1863 = vmatmul.msk.f32.gmra.mxu3 %vm662_vm1, %v3318_v35  ;;  %1881 = vmatmul.msk.f32.gmra.mxu0 %vm662_vm1, %v3318_v35  ;;  %v325_v62 = vadd.f32 %v2709_v1, %v2769_v16  ;;  %v3355_v6 = vld [vmem:[%s4321_s3 + $0x490] sm:$0xff]  ;;  %v3361_v1 = vld [vmem:[%s4321_s3 + $0x3b8] sm:$0xff] }
 0x12e   :  { %4406 = vst [vmem:[#allocation41_spill] sm:$0xff] %v3355_v6  ;;  %v197_v16 = vadd.f32 %v2707_v0, %v2743_v11  ;;  %1098 = vmatpush.msrb.mxu2 %v3361_v1  ;;  %962 = vmatpush.msrb.mxu1 %v3350_v52  ;;  %v3384_v0 = vld [vmem:[%s4321_s3 + $0x3b0] sm:$0xff] }
 0x12f   :  { %v627_v57 = vmax.f32 %v487_v38, %v602_v59  ;;  %v551_v41 = vpop.f32.mrf.mxu0  ;;  %v3372_v59 = vld [vmem:[%s4321_s3 + $0x230] sm:$0xff]  ;;  %4407 = vst [vmem:[#allocation42_spill] sm:$0xff] %v3377_v8  ;;  %1199 = vmatpush.msra.mxu3 %v3355_v6  ;;  %1240 = vmatpush.msra.mxu0 %v2977_v34  ;;  %v3405_v34 = vld [vmem:[%s4321_s3 + $0x480] sm:$0xff] }
 0x130   :  { %v348_v11 = vmax.f32 %v197_v16, %v325_v62  ;;  %1099 = vmatpush.msrb.mxu2 %v3384_v0  ;;  %963 = vmatpush.msrb.mxu1 %v3372_v59  ;;  %v3400_v62 = vld [vmem:[%s4321_s3 + $0x3a8] sm:$0xff]  ;;  %4408 = vst [vmem:[#allocation43_spill] sm:$0xff] %v3405_v34 }
 0x131   :  { %v643_v38 = vadd.f32 %v3006_v7, %v627_v57  ;;  %1200 = vmatpush.msra.mxu3 %v3377_v8  ;;  %v3414_v8 = vld [vmem:[%s4321_s3 + $0x220] sm:$0xff]  ;;  %1241 = vmatpush.msra.mxu0 %v3013_v33  ;;  %v3435_v33 = vld [vmem:[%s4321_s3 + $0x218] sm:$0xff] }
 0x132   :  { %v488_v16 = vmax.f32 %v348_v11, %v465_v40  ;;  %1100 = vmatpush.msrb.mxu2 %v3400_v62  ;;  %964 = vmatpush.msrb.mxu1 %v3391_v37  ;;  %v3421_v40 = vld [vmem:[%s4321_s3 + $0x3a0] sm:$0xff]  ;;  %v328_v11 = vadd.f32 %v2723_v5, %v2812_v27  ;;  %v3442_v5 = vld [vmem:[%s4321_s3 + $0x398] sm:$0xff]  ;;  %v3447_v27 = vld [vmem:[%s4321_s3 + $0x470] sm:$0xff] }
 0x133   :  { %v655_v24 = vmax.f32 %v643_v38, 0.0  ;;  %1201 = vmatpush.msra.mxu3 %v3405_v34  ;;  %v470_v60 = vpop.f32.mrf.mxu3  ;;  %1242 = vmatpush.msra.mxu0 %v3063_v28  ;;  %4410 = vst [vmem:[#allocation45_spill] sm:$0xff] %v3447_v27  ;;  %v3457_v28 = vld [vmem:[%s4321_s3 + $0x210] sm:$0xff] }
 0x134   :  { %v604_v12 = vpop.f32.mrf.mxu2  ;;  %v3393_v57 = vld [vmem:[#allocation2 + $0x20] sm:$0xff]  ;;  %1101 = vmatpush.msrb.mxu2 %v3421_v40  ;;  %965 = vmatpush.msrb.mxu1 %v3414_v8 }
 0x135   :  { %668 = vst.msk [vmem:[#allocation2 + $0x28] sm:$0xff] %vm662_vm1, %v655_v24  ;;  %v605_v38 = vadd.f32 %v604_v12, %v551_v41  ;;  %1882 = vmatmul.msk.f32.gmra.mxu0 %vm662_vm1, %v3393_v57  ;;  %v3426_v41 = vld [vmem:[%s4321_s3 + $0x478] sm:$0xff]  ;;  %v417_v24 = vpop.f32.mrf.mxu1 }
 0x136   :  { %4409 = vst [vmem:[#allocation44_spill] sm:$0xff] %v3426_v41  ;;  %1202 = vmatpush.msra.mxu3 %v3426_v41  ;;  %1102 = vmatpush.msrb.mxu2 %v3442_v5  ;;  %v3483_v41 = vld [vmem:[%s4321_s3 + $0x388] sm:$0xff] }
 0x137   :  { %v628_v12 = vmax.f32 %v488_v16, %v605_v38  ;;  %v554_v6 = vpop.f32.mrf.mxu0  ;;  %v200_v16 = vadd.f32 %v2721_v4, %v2775_v20  ;;  %v468_v38 = vadd.f32 %v467_v25, %v414_v51  ;;  %1243 = vmatpush.msra.mxu0 %v3126_v54  ;;  %966 = vmatpush.msrb.mxu1 %v3435_v33  ;;  %v3464_v4 = vld [vmem:[%s4321_s3 + $0x390] sm:$0xff]  ;;  %v3469_v20 = vld [vmem:[%s4321_s3 + $0x468] sm:$0xff] }
 0x138   :  { %4411 = vst [vmem:[#allocation46_spill] sm:$0xff] %v3469_v20  ;;  %1203 = vmatpush.msra.mxu3 %v3447_v27  ;;  %1103 = vmatpush.msrb.mxu2 %v3464_v4  ;;  %v3476_v54 = vld [vmem:[%s4321_s3 + $0x208] sm:$0xff] }
 0x139   :  { %v644_v34 = vadd.f32 %v3006_v7, %v628_v12  ;;  %v349_v51 = vmax.f32 %v200_v16, %v328_v11  ;;  %1244 = vmatpush.msra.mxu0 %v3197_v58  ;;  %967 = vmatpush.msrb.mxu1 %v3457_v28  ;;  %v3497_v58 = vld [vmem:[%s4321_s3 + $0x200] sm:$0xff] }
 0x13a   :  { %1204 = vmatpush.msra.mxu3 %v3469_v20  ;;  %1104 = vmatpush.msrb.mxu2 %v3483_v41 }
 0x13b   :  { %v656_v25 = vmax.f32 %v644_v34, 0.0  ;;  %v3488_v34 = vld [vmem:[%s4321_s3 + $0x460] sm:$0xff]  ;;  %v489_v11 = vmax.f32 %v349_v51, %v468_v38  ;;  %1245 = vmatpush.msra.mxu0 %v3207_v23  ;;  %968 = vmatpush.msrb.mxu1 %v3476_v54  ;;  %v3518_v23 = vld [vmem:[%s4321_s3 + $0x1f8] sm:$0xff]  ;;  %v473_v20 = vpop.f32.mrf.mxu3 }
 0x13c   :  { %v607_v12 = vpop.f32.mrf.mxu2  ;;  %4412 = vst [vmem:[#allocation47_spill] sm:$0xff] %v3488_v34  ;;  %v3504_v38 = vld [vmem:[%s4321_s3 + $0x380] sm:$0xff]  ;;  %1205 = vmatpush.msra.mxu3 %v3488_v34 }
 0x13d   :  { %669 = vst.msk [vmem:[#allocation2 + $0x30] sm:$0xff] %vm662_vm1, %v656_v25  ;;  %v608_v16 = vadd.f32 %v607_v12, %v554_v6  ;;  %1955 = vmatmul.msk.f32.vlgmr.msrb.gmra.mxu0 %vm662_vm1, %v3113_v36  ;;  %v3509_v36 = vld [vmem:[%s4321_s3 + $0x458] sm:$0xff]  ;;  %v331_v6 = vadd.f32 %v2741_v10, %v2859_v39  ;;  %969 = vmatpush.msrb.mxu1 %v3497_v58  ;;  %v3525_v12 = vld [vmem:[%s4321_s3 + $0x450] sm:$0xff] }
 0x13e   :  { %4413 = vst [vmem:[#allocation48_spill] sm:$0xff] %v3509_v36  ;;  %1246 = vmatpush.msra.mxu0 %v3242_v46  ;;  %v3530_v10 = vld [vmem:[%s4321_s3 + $0x378] sm:$0xff]  ;;  %v203_v39 = vadd.f32 %v2739_v9, %v2825_v32  ;;  %1105 = vmatpush.msrb.mxu2 %v3504_v38  ;;  %v3540_v46 = vld [vmem:[%s4321_s3 + $0x1f0] sm:$0xff]  ;;  %v3549_v32 = vld [vmem:[%s4321_s3 + $0x448] sm:$0xff] }
 0x13f   :  { %v629_v51 = vmax.f32 %v489_v11, %v608_v16  ;;  %v557_v25 = vpop.f32.mrf.mxu0  ;;  %4414 = vst [vmem:[#allocation49_spill] sm:$0xff] %v3525_v12  ;;  %v471_v11 = vadd.f32 %v470_v60, %v417_v24  ;;  %v420_v16 = vpop.f32.mrf.mxu1  ;;  %1206 = vmatpush.msra.mxu3 %v3509_v36  ;;  %970 = vmatpush.msrb.mxu1 %v3518_v23 }
 0x140   :  { %1247 = vmatpush.msra.mxu0 %v3257_v2  ;;  %v350_v27 = vmax.f32 %v203_v39, %v331_v6  ;;  %1106 = vmatpush.msrb.mxu2 %v3530_v10  ;;  %4415 = vst [vmem:[#allocation50_spill] sm:$0xff] %v3549_v32  ;;  %v3558_v2 = vld [vmem:[%s4321_s3 + $0x370] sm:$0xff]  ;;  %v334_v39 = vadd.f32 %v2773_v19, %v2892_v15 }
 0x141   :  { %v645_v34 = vadd.f32 %v3006_v7, %v629_v51  ;;  %1207 = vmatpush.msra.mxu3 %v3525_v12  ;;  %971 = vmatpush.msrb.mxu1 %v3540_v46  ;;  %v3607_v19 = vld [vmem:[%s4321_s3 + $0x430] sm:$0xff]  ;;  %v206_v15 = vadd.f32 %v2771_v18, %v2872_v45 }
 0x142   :  { %1373 = vmatpush.msrb.mxu0 %v3291_v47  ;;  %v490_v6 = vmax.f32 %v350_v27, %v471_v11  ;;  %v3573_v47 = vld [vmem:[%s4321_s3 + $0x440] sm:$0xff]  ;;  %v3581_v27 = vld [vmem:[%s4321_s3 + $0x368] sm:$0xff]  ;;  %1107 = vmatpush.msrb.mxu2 %v3558_v2 }
 0x143   :  { %v657_v9 = vmax.f32 %v645_v34, 0.0  ;;  %v3563_v34 = vld [vmem:[%s4321_s3 + $0x1e8] sm:$0xff]  ;;  %4416 = vst [vmem:[#allocation51_spill] sm:$0xff] %v3573_v47  ;;  %1208 = vmatpush.msra.mxu3 %v3549_v32  ;;  %v3602_v32 = vld [vmem:[%s4321_s3 + $0x360] sm:$0xff]  ;;  %v476_v36 = vpop.f32.mrf.mxu3 }
 0x144   :  { %v610_v60 = vpop.f32.mrf.mxu2  ;;  %v3551_v24 = vld [vmem:[#allocation2 + $0x30] sm:$0xff]  ;;  %972 = vmatpush.msrb.mxu1 %v3563_v34  ;;  %1374 = vmatpush.msrb.mxu0 %v3309_v17  ;;  %v351_v17 = vmax.f32 %v206_v15, %v334_v39  ;;  %v4419_v39 = vld [vmem:[#allocation10_spill] sm:$0xff]  ;;  %v3653_v15 = vld [vmem:[%s4321_s3 + $0x420] sm:$0xff] }
 0x145   :  { %670 = vst.msk [vmem:[#allocation2 + $0x38] sm:$0xff] %vm662_vm1, %v657_v9  ;;  %v611_v51 = vadd.f32 %v610_v60, %v557_v25  ;;  %1856 = vmatmul.msk.f32.vlgmr.msra.gmra.mxu1 %vm662_vm1, %v3551_v24  ;;  %1951 = vmatmul.msk.f32.vlgmr.msrb.gmra.mxu3 %vm662_vm1, %v3551_v24  ;;  %v3586_v25 = vld [vmem:[%s4321_s3 + $0x1e0] sm:$0xff]  ;;  %v3595_v60 = vld [vmem:[%s4321_s3 + $0x438] sm:$0xff] }
 0x146   :  { %1956 = vmatmul.msk.f32.gmra.mxu0 %vm662_vm1, %v3177_v50  ;;  %4417 = vst [vmem:[#allocation52_spill] sm:$0xff] %v3595_v60  ;;  %1209 = vmatpush.msra.mxu3 %v3573_v47 }
 0x147   :  { %v630_v11 = vmax.f32 %v490_v6, %v611_v51  ;;  %v560_v9 = vpop.f32.mrf.mxu0  ;;  %v474_v6 = vadd.f32 %v473_v20, %v420_v16  ;;  %1108 = vmatpush.msrb.mxu2 %v3581_v27  ;;  %973 = vmatpush.msrb.mxu1 %v3586_v25  ;;  %v423_v47 = vpop.f32.mrf.mxu1  ;;  %v3624_v20 = vld [vmem:[%s4321_s3 + $0x358] sm:$0xff] }
 0x148   :  { %1210 = vmatpush.msra.mxu3 %v3595_v60  ;;  %1375 = vmatpush.msrb.mxu0 %v3329_v29 }
 0x149   :  { %v646_v51 = vadd.f32 %v3006_v7, %v630_v11  ;;  %1109 = vmatpush.msrb.mxu2 %v3602_v32  ;;  %1147 = vmatpush.msra.mxu1 %v3607_v19  ;;  %v491_v29 = vmax.f32 %v351_v17, %v474_v6  ;;  %v3660_v17 = vld [vmem:[%s4321_s3 + $0x348] sm:$0xff] }
 0x14a   :  { %1376 = vmatpush.msrb.mxu0 %v3350_v52  ;;  %1324 = vmatpush.msrb.mxu3 %v2753_v13  ;;  %v3635_v52 = vld [vmem:[%s4321_s3 + $0x428] sm:$0xff]  ;;  %v3644_v13 = vld [vmem:[%s4321_s3 + $0x350] sm:$0xff] }
 0x14b   :  { %v658_v12 = vmax.f32 %v646_v51, 0.0  ;;  %1110 = vmatpush.msrb.mxu2 %v3624_v20  ;;  %1148 = vmatpush.msra.mxu1 %v3635_v52  ;;  %v4420_v51 = vld [vmem:[#allocation5_spill] sm:$0xff] }
 0x14c   :  { %v613_v18 = vpop.f32.mrf.mxu2  ;;  %v3618_v45 = vld [vmem:[#allocation2 + $0x38] sm:$0xff]  ;;  %1377 = vmatpush.msrb.mxu0 %v3372_v59  ;;  %1325 = vmatpush.msrb.mxu3 %v4420_v51  ;;  %v4423_v51 = vld [vmem:[#allocation7_spill] sm:$0xff] }
 0x14d   :  { %671 = vst.msk [vmem:[#allocation2 + $0x40] sm:$0xff] %vm662_vm1, %v658_v12  ;;  %v614_v16 = vadd.f32 %v613_v18, %v560_v9  ;;  %1857 = vmatmul.msk.f32.gmra.mxu1 %vm662_vm1, %v3618_v45  ;;  %1898 = vmatmul.msk.f32.vlgmr.msra.gmra.mxu2 %vm662_vm1, %v3618_v45  ;;  %v4418_v12 = vld [vmem:[#allocation19_spill] sm:$0xff]  ;;  %v4421_v18 = vld [vmem:[#allocation18_spill] sm:$0xff] }
 0x14e   :  { %1952 = vmatmul.msk.f32.gmra.mxu3 %vm662_vm1, %v3618_v45  ;;  %1957 = vmatmul.msk.f32.gmra.mxu0 %vm662_vm1, %v3259_v14  ;;  %v337_v11 = vadd.f32 %v4419_v39, %v4418_v12  ;;  %v477_v12 = vadd.f32 %v476_v36, %v423_v47  ;;  %v3670_v39 = vld [vmem:[%s4321_s3 + $0x418] sm:$0xff] }
 0x14f   :  { %v631_v9 = vmax.f32 %v491_v29, %v614_v16  ;;  %v563_v6 = vpop.f32.mrf.mxu0  ;;  %v4422_v29 = vld [vmem:[#allocation8_spill] sm:$0xff]  ;;  %1111 = vmatpush.msrb.mxu2 %v3644_v13  ;;  %1378 = vmatpush.msrb.mxu0 %v3391_v37 }
 0x150   :  { %v209_v16 = vadd.f32 %v4422_v29, %v4421_v18  ;;  %1149 = vmatpush.msra.mxu1 %v3653_v15  ;;  %1326 = vmatpush.msrb.mxu3 %v4423_v51  ;;  %v479_v29 = vpop.f32.mrf.mxu3  ;;  %v4428_v51 = vld [vmem:[#allocation4_spill] sm:$0xff] }
 0x151   :  { %v647_v59 = vadd.f32 %v3006_v7, %v631_v9  ;;  %1112 = vmatpush.msrb.mxu2 %v3660_v17  ;;  %1379 = vmatpush.msrb.mxu0 %v3414_v8  ;;  %v4424_v9 = vld [vmem:[#allocation3_spill] sm:$0xff]  ;;  %v3688_v8 = vld [vmem:[%s4321_s3 + $0x410] sm:$0xff] }
 0x152   :  { %v352_v60 = vmax.f32 %v209_v16, %v337_v11  ;;  %1150 = vmatpush.msra.mxu1 %v3670_v39  ;;  %v426_v11 = vpop.f32.mrf.mxu1 }
 0x153   :  { %v659_v61 = vmax.f32 %v647_v59, 0.0  ;;  %1262 = vmatpush.msra.mxu2 %v4424_v9  ;;  %1380 = vmatpush.msrb.mxu0 %v3435_v33  ;;  %v3701_v59 = vld [vmem:[%s4321_s3 + $0x408] sm:$0xff]  ;;  %v4430_v9 = vld [vmem:[#allocation15_spill] sm:$0xff]  ;;  %v480_v56 = vadd.f32 %v479_v29, %v426_v11 }
 0x154   :  { %v616_v36 = vpop.f32.mrf.mxu2  ;;  %v3676_v47 = vld [vmem:[#allocation2 + $0x40] sm:$0xff]  ;;  %v492_v37 = vmax.f32 %v352_v60, %v477_v12  ;;  %v4426_v60 = vld [vmem:[#allocation16_spill] sm:$0xff]  ;;  %1151 = vmatpush.msra.mxu1 %v3688_v8 }
 0x155   :  { %672 = vst.msk [vmem:[#allocation2 + $0x48] sm:$0xff] %vm662_vm1, %v659_v61  ;;  %v617_v18 = vadd.f32 %v616_v36, %v563_v6  ;;  %1858 = vmatmul.msk.f32.gmra.mxu1 %vm662_vm1, %v3676_v47  ;;  %1899 = vmatmul.msk.f32.gmra.mxu2 %vm662_vm1, %v3676_v47  ;;  %v4425_v61 = vld [vmem:[#allocation22_spill] sm:$0xff]  ;;  %v4427_v12 = vld [vmem:[#allocation12_spill] sm:$0xff]  ;;  %v4429_v36 = vld [vmem:[#allocation21_spill] sm:$0xff] }
 0x156   :  { %1953 = vmatmul.msk.f32.gmra.mxu3 %vm662_vm1, %v3676_v47  ;;  %1958 = vmatmul.msk.f32.gmra.mxu0 %vm662_vm1, %v3318_v35  ;;  %v340_v6 = vadd.f32 %v4426_v60, %v4425_v61  ;;  %v212_v3 = vadd.f32 %v4430_v9, %v4429_v36  ;;  %v3713_v33 = vld [vmem:[%s4321_s3 + $0x400] sm:$0xff]  ;;  %v4432_v60 = vld [vmem:[#allocation6_spill] sm:$0xff]  ;;  %v4433_v36 = vld [vmem:[#allocation20_spill] sm:$0xff] }
 0x157   :  { %v632_v16 = vmax.f32 %v492_v37, %v617_v18  ;;  %1327 = vmatpush.msrb.mxu3 %v4427_v12  ;;  %1263 = vmatpush.msra.mxu2 %v4428_v51  ;;  %v4431_v37 = vld [vmem:[#allocation17_spill] sm:$0xff]  ;;  %v566_v18 = vpop.f32.mrf.mxu0 }
 0x158   :  { %1381 = vmatpush.msrb.mxu0 %v3457_v28  ;;  %1152 = vmatpush.msra.mxu1 %v3701_v59  ;;  %v353_v12 = vmax.f32 %v212_v3, %v340_v6  ;;  %v4434_v28 = vld [vmem:[#allocation9_spill] sm:$0xff]  ;;  %v3731_v3 = vld [vmem:[%s4321_s3 + $0x3f8] sm:$0xff] }
 0x159   :  { %v648_v61 = vadd.f32 %v3006_v7, %v632_v16  ;;  %1328 = vmatpush.msrb.mxu3 %v4431_v37  ;;  %1264 = vmatpush.msra.mxu2 %v4432_v60  ;;  %v3742_v6 = vld [vmem:[%s4321_s3 + $0x3f0] sm:$0xff]  ;;  %v3752_v60 = vld [vmem:[%s4321_s3 + $0x3e8] sm:$0xff] }
 0x15a   :  { %1382 = vmatpush.msrb.mxu0 %v3476_v54  ;;  %1153 = vmatpush.msra.mxu1 %v3713_v33  ;;  %v493_v16 = vmax.f32 %v353_v12, %v480_v56  ;;  %v4435_v54 = vld [vmem:[#allocation23_spill] sm:$0xff] }
 0x15b   :  { %v660_v51 = vmax.f32 %v648_v61, 0.0  ;;  %1329 = vmatpush.msrb.mxu3 %v4433_v36  ;;  %1265 = vmatpush.msra.mxu2 %v4434_v28  ;;  %v4436_v61 = vld [vmem:[#allocation11_spill] sm:$0xff]  ;;  %v2097_v36 = vld [vmem:[%s4321_s3 + $0x18] sm:$0xff] }
 0x15c   :  { %v619_v11 = vpop.f32.mrf.mxu2  ;;  %v3719_v29 = vld [vmem:[#allocation2 + $0x48] sm:$0xff]  ;;  %1383 = vmatpush.msrb.mxu0 %v3497_v58  ;;  %1154 = vmatpush.msra.mxu1 %v3731_v3  ;;  %v4438_v58 = vld [vmem:[#allocation13_spill] sm:$0xff] }
 0x15d   :  { %673 = vst.msk [vmem:[#allocation2 + $0x50] sm:$0xff] %vm662_vm1, %v660_v51  ;;  %v620_v9 = vadd.f32 %v619_v11, %v566_v18  ;;  %1859 = vmatmul.msk.f32.gmra.mxu1 %vm662_vm1, %v3719_v29  ;;  %1900 = vmatmul.msk.f32.gmra.mxu2 %vm662_vm1, %v3719_v29  ;;  %v4437_v18 = vld [vmem:[#allocation24_spill] sm:$0xff]  ;;  %v2115_v11 = vld [vmem:[%s4321_s3 + $0xf0] sm:$0xff] }
 0x15e   :  { %1954 = vmatmul.msk.f32.gmra.mxu3 %vm662_vm1, %v3719_v29  ;;  %2016 = vmatmul.msk.f32.vlgmr.msra.gmra.mxu0 %vm662_vm1, %v3177_v50 }
 0x15f   :  { %v633_v56 = vmax.f32 %v493_v16, %v620_v9  ;;  %1330 = vmatpush.msrb.mxu3 %v4435_v54  ;;  %1266 = vmatpush.msra.mxu2 %v4436_v61  ;;  %v4446_v16 = vld [vmem:[#allocation35_spill] sm:$0xff]  ;;  %v2119_v9 = vld [vmem:[%s4321_s3 + $0x2b0] sm:$0xff]  ;;  %v2120_v54 = vld [vmem:[%s4321_s3 + $0x2a8] sm:$0xff] }
 0x160   :  { %1384 = vmatpush.msrb.mxu0 %v3518_v23  ;;  %1155 = vmatpush.msra.mxu1 %v3742_v6  ;;  %v3781_v23 = vld [vmem:[%s4321_s3 + $0x3d8] sm:$0xff] }
 0x161   :  { %v649_v37 = vadd.f32 %v3006_v7, %v633_v56  ;;  %1331 = vmatpush.msrb.mxu3 %v4437_v18  ;;  %1267 = vmatpush.msra.mxu2 %v4438_v58  ;;  %v4439_v7 = vld [vmem:[#allocation14_spill] sm:$0xff]  ;;  %v4451_v18 = vld [vmem:[#allocation40_spill] sm:$0xff]  ;;  %v4452_v58 = vld [vmem:[#allocation41_spill] sm:$0xff] }
 0x162   :  { %1385 = vmatpush.msrb.mxu0 %v3540_v46  ;;  %1156 = vmatpush.msra.mxu1 %v3752_v60  ;;  %v2093_v46 = vld [vmem:[%s4321_s3 + $0x38] sm:$0xff] }
 0x163   :  { %v661_v12 = vmax.f32 %v649_v37, 0.0  ;;  %1332 = vmatpush.msrb.mxu3 %v3018_v22  ;;  %1268 = vmatpush.msra.mxu2 %v4439_v7  ;;  %v3770_v22 = vld [vmem:[%s4321_s3 + $0x3e0] sm:$0xff]  ;;  %v4449_v56 = vld [vmem:[#allocation38_spill] sm:$0xff] }
 0x164   :  { %v3758_v51 = vld [vmem:[#allocation2 + $0x50] sm:$0xff]  ;;  %1386 = vmatpush.msrb.mxu0 %v3563_v34  ;;  %1157 = vmatpush.msra.mxu1 %v3770_v22  ;;  %v2121_v37 = vld [vmem:[%s4321_s3 + $0x2a0] sm:$0xff]  ;;  %v4453_v7 = vld [vmem:[#allocation42_spill] sm:$0xff] }
 0x165   :  { %674 = vst.msk [vmem:[#allocation2 + $0x58] sm:$0xff] %vm662_vm1, %v661_v12  ;;  %1901 = vmatmul.msk.f32.gmra.mxu2 %vm662_vm1, %v3758_v51  ;;  %1917 = vmatmul.msk.f32.vlgmr.msrb.gmra.mxu1 %vm662_vm1, %v3259_v14  ;;  %v2094_v34 = vld [vmem:[%s4321_s3 + $0x30] sm:$0xff] }
 0x166   :  { %2012 = vmatmul.msk.f32.vlgmr.msra.gmra.mxu3 %vm662_vm1, %v3259_v14  ;;  %2017 = vmatmul.msk.f32.gmra.mxu0 %vm662_vm1, %v3259_v14  ;;  %v2123_v12 = vld [vmem:[%s4321_s3 + $0x290] sm:$0xff] }
 0x167   :  { %1333 = vmatpush.msrb.mxu3 %v3068_v42  ;;  %1269 = vmatpush.msra.mxu2 %v2093_v46  ;;  %v3792_v42 = vld [vmem:[%s4321_s3 + $0x3d0] sm:$0xff]  ;;  %v2124_v46 = vld [vmem:[%s4321_s3 + $0x288] sm:$0xff] }
 0x168   :  { %1387 = vmatpush.msrb.mxu0 %v3586_v25  ;;  %1158 = vmatpush.msra.mxu1 %v3781_v23  ;;  %v3807_v25 = vld [vmem:[%s4321_s3 + $0x3c8] sm:$0xff] }
 0x169   :  { %1334 = vmatpush.msrb.mxu3 %v3131_v49  ;;  %1270 = vmatpush.msra.mxu2 %v2094_v34  ;;  %v2095_v49 = vld [vmem:[%s4321_s3 + $0x28] sm:$0xff]  ;;  %v2125_v34 = vld [vmem:[%s4321_s3 + $0x280] sm:$0xff] }
 0x16a   :  { %1501 = vmatpush.msra.mxu0 %v3607_v19  ;;  %1159 = vmatpush.msra.mxu1 %v3792_v42  ;;  %v2096_v19 = vld [vmem:[%s4321_s3 + $0x20] sm:$0xff] }
 0x16b   :  { %1335 = vmatpush.msrb.mxu3 %v3202_v63  ;;  %1271 = vmatpush.msra.mxu2 %v2095_v49  ;;  %v3820_v63 = vld [vmem:[%s4321_s3 + $0x3c0] sm:$0xff]  ;;  %v2126_v49 = vld [vmem:[%s4321_s3 + $0x278] sm:$0xff] }
 0x16c   :  { %1160 = vmatpush.msra.mxu1 %v3807_v25  ;;  %1502 = vmatpush.msra.mxu0 %v3635_v52  ;;  %v2101_v52 = vld [vmem:[%s4321_s3 + $0x158] sm:$0xff] }
 0x16d   :  { %1918 = vmatmul.msk.f32.gmra.mxu1 %vm662_vm1, %v3318_v35  ;;  %1974 = vmatmul.msk.f32.vlgmr.msrb.gmra.mxu2 %vm662_vm1, %v3177_v50 }
 0x16e   :  { %2013 = vmatmul.msk.f32.gmra.mxu3 %vm662_vm1, %v3318_v35  ;;  %2018 = vmatmul.msk.f32.gmra.mxu0 %vm662_vm1, %v3318_v35 }
 0x16f   :  { %1336 = vmatpush.msrb.mxu3 %v3214_v30  ;;  %1272 = vmatpush.msra.mxu2 %v2096_v19  ;;  %v2098_v30 = vld [vmem:[%s4321_s3 + $0x160] sm:$0xff]  ;;  %v4457_v19 = vld [vmem:[#allocation29_spill] sm:$0xff] }
 0x170   :  { %1161 = vmatpush.msra.mxu1 %v3820_v63  ;;  %1503 = vmatpush.msra.mxu0 %v3653_v15  ;;  %v2103_v15 = vld [vmem:[%s4321_s3 + $0x150] sm:$0xff] }
 0x171   :  { %1337 = vmatpush.msrb.mxu3 %v3270_v21  ;;  %1273 = vmatpush.msra.mxu2 %v2097_v36  ;;  %v2099_v21 = vld [vmem:[%s4321_s3 + $0x10] sm:$0xff]  ;;  %v4458_v36 = vld [vmem:[#allocation46_spill] sm:$0xff] }
 0x172   :  { %1291 = vmatpush.msrb.mxu1 %v2098_v30  ;;  %1504 = vmatpush.msra.mxu0 %v3670_v39  ;;  %v3868_v39 = vld [vmem:[#allocation2 + $0x28] sm:$0xff] }
 0x173   :  { %1338 = vmatpush.msrb.mxu3 %v3323_v48  ;;  %1274 = vmatpush.msra.mxu2 %v2099_v21  ;;  %v2100_v48 = vld [vmem:[%s4321_s3 + $0x8] sm:$0xff]  ;;  %v4459_v21 = vld [vmem:[#allocation30_spill] sm:$0xff] }
 0x174   :  { %1505 = vmatpush.msra.mxu0 %v3688_v8  ;;  %1292 = vmatpush.msrb.mxu1 %v2101_v52  ;;  %v4440_v8 = vld [vmem:[#allocation25_spill] sm:$0xff]  ;;  %v4461_v52 = vld [vmem:[#allocation32_spill] sm:$0xff] }
 0x175   :  { %1919 = vmatmul.msk.f32.gmra.mxu1 %vm662_vm1, %v3393_v57  ;;  %1975 = vmatmul.msk.f32.gmra.mxu2 %vm662_vm1, %v3259_v14 }
 0x176   :  { %2014 = vmatmul.msk.f32.gmra.mxu3 %vm662_vm1, %v3393_v57  ;;  %2019 = vmatmul.msk.f32.gmra.mxu0 %vm662_vm1, %v3393_v57 }
 0x177   :  { %1468 = vmatpush.msra.mxu3 %v3361_v1  ;;  %1275 = vmatpush.msra.mxu2 %v2100_v48  ;;  %v2102_v1 = vld [vmem:[%s4321_s3] sm:$0xff] }
 0x178   :  { %1506 = vmatpush.msra.mxu0 %v3701_v59  ;;  %1293 = vmatpush.msrb.mxu1 %v2103_v15  ;;  %v4444_v59 = vld [vmem:[#allocation31_spill] sm:$0xff]  ;;  %v4464_v15 = vld [vmem:[#allocation49_spill] sm:$0xff] }
 0x179   :  { %1469 = vmatpush.msra.mxu3 %v3384_v0  ;;  %1276 = vmatpush.msra.mxu2 %v2102_v1  ;;  %v2104_v0 = vld [vmem:[%s4321_s3 + $0x148] sm:$0xff]  ;;  %v4460_v48 = vld [vmem:[#allocation47_spill] sm:$0xff] }
 0x17a   :  { %1507 = vmatpush.msra.mxu0 %v3713_v33  ;;  %1294 = vmatpush.msrb.mxu1 %v2104_v0  ;;  %v4445_v33 = vld [vmem:[#allocation33_spill] sm:$0xff]  ;;  %v4462_v1 = vld [vmem:[#allocation48_spill] sm:$0xff]  ;;  %v4465_v0 = vld [vmem:[#allocation50_spill] sm:$0xff] }
 0x17b   :  { %1470 = vmatpush.msra.mxu3 %v3400_v62  ;;  %1410 = vmatpush.msrb.mxu2 %v3032_v44  ;;  %v2105_v44 = vld [vmem:[%s4321_s3 + $0x140] sm:$0xff]  ;;  %v2106_v62 = vld [vmem:[%s4321_s3 + $0x138] sm:$0xff] }
 0x17c   :  { %1508 = vmatpush.msra.mxu0 %v3731_v3  ;;  %1295 = vmatpush.msrb.mxu1 %v2105_v44 }
 0x17d   :  { %1920 = vmatmul.msk.f32.gmra.mxu1 %vm662_vm1, %v3868_v39  ;;  %1976 = vmatmul.msk.f32.gmra.mxu2 %vm662_vm1, %v3318_v35 }
 0x17e   :  { %2015 = vmatmul.msk.f32.gmra.mxu3 %vm662_vm1, %v3868_v39  ;;  %2032 = vmatmul.msk.f32.vlgmr.msrb.gmra.mxu0 %vm662_vm1, %v3676_v47 }
 0x17f   :  { %1471 = vmatpush.msra.mxu3 %v3421_v40  ;;  %1411 = vmatpush.msrb.mxu2 %v3044_v55  ;;  %v2107_v40 = vld [vmem:[%s4321_s3 + $0x130] sm:$0xff]  ;;  %v4441_v55 = vld [vmem:[#allocation26_spill] sm:$0xff] }
 0x180   :  { %1509 = vmatpush.msra.mxu0 %v3742_v6  ;;  %1296 = vmatpush.msrb.mxu1 %v2106_v62  ;;  %v4450_v6 = vld [vmem:[#allocation39_spill] sm:$0xff] }
 0x181   :  { %1472 = vmatpush.msra.mxu3 %v3442_v5  ;;  %1412 = vmatpush.msrb.mxu2 %v4440_v8  ;;  %v2108_v5 = vld [vmem:[%s4321_s3 + $0x128] sm:$0xff] }
 0x182   :  { %1510 = vmatpush.msra.mxu0 %v3752_v60  ;;  %1297 = vmatpush.msrb.mxu1 %v2107_v40  ;;  %v2122_v60 = vld [vmem:[%s4321_s3 + $0x298] sm:$0xff]  ;;  %v4466_v40 = vld [vmem:[#allocation51_spill] sm:$0xff] }
 0x183   :  { %1473 = vmatpush.msra.mxu3 %v3464_v4  ;;  %1413 = vmatpush.msrb.mxu2 %v4441_v55  ;;  %v2109_v4 = vld [vmem:[%s4321_s3 + $0x120] sm:$0xff]  ;;  %v4467_v55 = vld [vmem:[#allocation52_spill] sm:$0xff] }
 0x184   :  { %1511 = vmatpush.msra.mxu0 %v3770_v22  ;;  %1298 = vmatpush.msrb.mxu1 %v2108_v5 }
 0x185   :  { %1977 = vmatmul.msk.f32.gmra.mxu2 %vm662_vm1, %v3393_v57  ;;  %1993 = vmatmul.msk.f32.vlgmr.msra.gmra.mxu1 %vm662_vm1, %v3618_v45 }
 0x186   :  { %2028 = vmatmul.msk.f32.vlgmr.msrb.gmra.mxu3 %vm662_vm1, %v3259_v14  ;;  %2033 = vmatmul.msk.f32.gmra.mxu0 %vm662_vm1, %v3719_v29 }
 0x187   :  { %1474 = vmatpush.msra.mxu3 %v3483_v41  ;;  %1414 = vmatpush.msrb.mxu2 %v3088_v26  ;;  %v2110_v41 = vld [vmem:[%s4321_s3 + $0x118] sm:$0xff]  ;;  %v4442_v26 = vld [vmem:[#allocation27_spill] sm:$0xff] }
 0x188   :  { %1512 = vmatpush.msra.mxu0 %v3781_v23  ;;  %1299 = vmatpush.msrb.mxu1 %v2109_v4 }
 0x189   :  { %1475 = vmatpush.msra.mxu3 %v3504_v38  ;;  %1415 = vmatpush.msrb.mxu2 %v3104_v31  ;;  %v2111_v31 = vld [vmem:[%s4321_s3 + $0x110] sm:$0xff]  ;;  %v4443_v38 = vld [vmem:[#allocation28_spill] sm:$0xff] }
 0x18a   :  { %1513 = vmatpush.msra.mxu0 %v3792_v42  ;;  %1300 = vmatpush.msrb.mxu1 %v2110_v41  ;;  %v4454_v42 = vld [vmem:[#allocation43_spill] sm:$0xff] }
 0x18b   :  { %1476 = vmatpush.msra.mxu3 %v3530_v10  ;;  %1416 = vmatpush.msrb.mxu2 %v4442_v26  ;;  %v2112_v10 = vld [vmem:[%s4321_s3 + $0x108] sm:$0xff] }
 0x18c   :  { %1514 = vmatpush.msra.mxu0 %v3807_v25  ;;  %1301 = vmatpush.msrb.mxu1 %v2111_v31  ;;  %v4456_v25 = vld [vmem:[#allocation45_spill] sm:$0xff] }
 0x18d   :  { %1994 = vmatmul.msk.f32.gmra.mxu1 %vm662_vm1, %v3676_v47  ;;  %2020 = vmatmul.msk.f32.vlgmr.msra.gmra.mxu2 %vm662_vm1, %v3551_v24 }
 0x18e   :  { %2029 = vmatmul.msk.f32.gmra.mxu3 %vm662_vm1, %v3318_v35  ;;  %2034 = vmatmul.msk.f32.gmra.mxu0 %vm662_vm1, %v3758_v51 }
 0x18f   :  { %1477 = vmatpush.msra.mxu3 %v3558_v2  ;;  %1417 = vmatpush.msrb.mxu2 %v4443_v38  ;;  %v2113_v2 = vld [vmem:[%s4321_s3 + $0x100] sm:$0xff] }
 0x190   :  { %1515 = vmatpush.msra.mxu0 %v3820_v63  ;;  %1302 = vmatpush.msrb.mxu1 %v2112_v10 }
 0x191   :  { %1478 = vmatpush.msra.mxu3 %v3581_v27  ;;  %1418 = vmatpush.msrb.mxu2 %v4444_v59  ;;  %v3955_v27 = vld [vmem:[#allocation2 + $0x58] sm:$0xff] }
 0x192   :  { %1303 = vmatpush.msrb.mxu1 %v2113_v2 }
 0x193   :  { %1479 = vmatpush.msra.mxu3 %v3602_v32  ;;  %1419 = vmatpush.msrb.mxu2 %v4445_v33  ;;  %v2114_v32 = vld [vmem:[%s4321_s3 + $0xf8] sm:$0xff] }
 0x194   :  { %1304 = vmatpush.msrb.mxu1 %v2114_v32 }
 0x195   :  { %1995 = vmatmul.msk.f32.gmra.mxu1 %vm662_vm1, %v3719_v29  ;;  %2021 = vmatmul.msk.f32.gmra.mxu2 %vm662_vm1, %v3618_v45 }
 0x196   :  { %2030 = vmatmul.msk.f32.gmra.mxu3 %vm662_vm1, %v3393_v57  ;;  %2035 = vmatmul.msk.f32.gmra.mxu0 %vm662_vm1, %v3955_v27 }
 0x197   :  { %1480 = vmatpush.msra.mxu3 %v3624_v20  ;;  %1420 = vmatpush.msrb.mxu2 %v3219_v53  ;;  %v2116_v20 = vld [vmem:[%s4321_s3 + $0x2c8] sm:$0xff]  ;;  %v2117_v53 = vld [vmem:[%s4321_s3 + $0x2c0] sm:$0xff] }
 0x198   :  { %1305 = vmatpush.msrb.mxu1 %v2115_v11  ;;  %v784_v3 = vpop.f32.mrf.mxu3 }
 0x199   :  { %1481 = vmatpush.msra.mxu3 %v3644_v13  ;;  %1421 = vmatpush.msrb.mxu2 %v3230_v43  ;;  %v4447_v43 = vld [vmem:[#allocation36_spill] sm:$0xff]  ;;  %v2118_v13 = vld [vmem:[%s4321_s3 + $0x2b8] sm:$0xff] }
 0x19a   :  { %1439 = vmatpush.msra.mxu1 %v2116_v20  ;;  %v3974_v28 = vpop.f32.mrf.mxu0 }
 0x19b   :  { %1482 = vmatpush.msra.mxu3 %v3660_v17  ;;  %1422 = vmatpush.msrb.mxu2 %v4446_v16  ;;  %v4448_v17 = vld [vmem:[#allocation37_spill] sm:$0xff] }
 0x19c   :  { %1440 = vmatpush.msra.mxu1 %v2117_v53 }
 0x19d   :  { %1996 = vmatmul.msk.f32.gmra.mxu1 %vm662_vm1, %v3758_v51  ;;  %2022 = vmatmul.msk.f32.gmra.mxu2 %vm662_vm1, %v3676_v47 }
 0x19e   :  { %2031 = vmatmul.msk.f32.gmra.mxu3 %vm662_vm1, %v3868_v39  ;;  %2048 = vmatmul.msk.f32.vlgmr.msra.gmra.mxu0 %vm662_vm1, %v3259_v14 }
 0x19f   :  { %1423 = vmatpush.msrb.mxu2 %v4447_v43  ;;  %1441 = vmatpush.msra.mxu1 %v2118_v13 }
 0x1a0   :  { %v787_v22 = vpop.f32.mrf.mxu3 }
 0x1a1   :  { %1424 = vmatpush.msrb.mxu2 %v4448_v17  ;;  %1442 = vmatpush.msra.mxu1 %v2119_v9 }
 0x1a2   :  { %v4002_v61 = vpop.f32.mrf.mxu0 }
 0x1a3   :  { %1534 = vmatpush.msra.mxu2 %v4449_v56  ;;  %1443 = vmatpush.msra.mxu1 %v2120_v54 }
 0x1a5   :  { %1535 = vmatpush.msra.mxu2 %v4450_v6  ;;  %2024 = vmatmul.msk.f32.vlgmr.msrb.gmra.mxu1 %vm662_vm1, %v3618_v45 }
 0x1a6   :  { %2023 = vmatmul.msk.f32.gmra.mxu2 %vm662_vm1, %v3719_v29  ;;  %2044 = vmatmul.msk.f32.vlgmr.msra.gmra.mxu3 %vm662_vm1, %v3618_v45 }
 0x1a7   :  { %2049 = vmatmul.msk.f32.gmra.mxu0 %vm662_vm1, %v3318_v35  ;;  %1444 = vmatpush.msra.mxu1 %v2121_v37 }
 0x1a8   :  { %1536 = vmatpush.msra.mxu2 %v4451_v18  ;;  %v790_v63 = vpop.f32.mrf.mxu3 }
 0x1a9   :  { %1445 = vmatpush.msra.mxu1 %v2122_v60 }
 0x1aa   :  { %1537 = vmatpush.msra.mxu2 %v4452_v58  ;;  %v851_v23 = vpop.f32.mrf.mxu0 }
 0x1ab   :  { %1446 = vmatpush.msra.mxu1 %v2123_v12 }
 0x1ac   :  { %1538 = vmatpush.msra.mxu2 %v4453_v7 }
 0x1ad   :  { %2025 = vmatmul.msk.f32.gmra.mxu1 %vm662_vm1, %v3676_v47 }
 0x1ae   :  { %2036 = vmatmul.msk.f32.vlgmr.msrb.gmra.mxu2 %vm662_vm1, %v3177_v50  ;;  %2045 = vmatmul.msk.f32.gmra.mxu3 %vm662_vm1, %v3676_v47  ;;  %v4455_v50 = vld [vmem:[#allocation44_spill] sm:$0xff] }
 0x1af   :  { %2050 = vmatmul.msk.f32.gmra.mxu0 %vm662_vm1, %v3393_v57  ;;  %1447 = vmatpush.msra.mxu1 %v2124_v46 }
 0x1b0   :  { %1539 = vmatpush.msra.mxu2 %v4454_v42 }
 0x1b1   :  { %1448 = vmatpush.msra.mxu1 %v2125_v34 }
 0x1b2   :  { %1540 = vmatpush.msra.mxu2 %v4455_v50  ;;  %v854_v30 = vpop.f32.mrf.mxu0 }
 0x1b3   :  { %1449 = vmatpush.msra.mxu1 %v2126_v49 }
 0x1b4   :  { %1541 = vmatpush.msra.mxu2 %v4456_v25 }
 0x1b5   :  { %2026 = vmatmul.msk.f32.gmra.mxu1 %vm662_vm1, %v3719_v29 }
 0x1b6   :  { %2037 = vmatmul.msk.f32.gmra.mxu2 %vm662_vm1, %v3259_v14  ;;  %2046 = vmatmul.msk.f32.gmra.mxu3 %vm662_vm1, %v3719_v29  ;;  %v4463_v14 = vld [vmem:[#allocation34_spill] sm:$0xff] }
 0x1b7   :  { %2051 = vmatmul.msk.f32.gmra.mxu0 %vm662_vm1, %v3868_v39  ;;  %1450 = vmatpush.msra.mxu1 %v4457_v19  ;;  %v793_v39 = vpop.f32.mrf.mxu3 }
 0x1b8   :  { %1542 = vmatpush.msra.mxu2 %v4458_v36 }
 0x1b9   :  { %1451 = vmatpush.msra.mxu1 %v4459_v21 }
 0x1ba   :  { %1543 = vmatpush.msra.mxu2 %v4460_v48  ;;  %v1069_v62 = vpop.f32.mrf.mxu0 }
 0x1bb   :  { %1452 = vmatpush.msra.mxu1 %v4461_v52 }
 0x1bc   :  { %1544 = vmatpush.msra.mxu2 %v4462_v1 }
 0x1bd   :  { %2027 = vmatmul.msk.f32.gmra.mxu1 %vm662_vm1, %v3758_v51 }
 0x1be   :  { %2038 = vmatmul.msk.f32.gmra.mxu2 %vm662_vm1, %v3318_v35  ;;  %2047 = vmatmul.msk.f32.gmra.mxu3 %vm662_vm1, %v3758_v51 }
 0x1bf   :  { %1453 = vmatpush.msra.mxu1 %v4463_v14  ;;  %1545 = vmatpush.msra.mxu2 %v4464_v15 }
 0x1c1   :  { %1546 = vmatpush.msra.mxu2 %v4465_v0 }
 0x1c2   :  { %v743_v44 = vpop.f32.mrf.mxu1 }
 0x1c3   :  { %v785_v8 = vadd.f32 %v784_v3, %v743_v44  ;;  %1547 = vmatpush.msra.mxu2 %v4466_v40  ;;  %v1072_v31 = vpop.f32.mrf.mxu0 }
 0x1c5   :  { %2040 = vmatmul.msk.f32.vlgmr.msra.gmra.mxu1 %vm662_vm1, %v3551_v24  ;;  %v857_v35 = vadd.f32 %v3974_v28, %v785_v8  ;;  %1548 = vmatpush.msra.mxu2 %v4467_v55 }
 0x1c6   :  { %2039 = vmatmul.msk.f32.gmra.mxu2 %vm662_vm1, %v3393_v57 }
 0x1c8   :  { %v1040_v5 = vpop.f32.mrf.mxu3 }
 0x1c9   :  { %v1070_v4 = vadd.f32 %v1069_v62, %v1040_v5 }
 0x1ca   :  { %v746_v41 = vpop.f32.mrf.mxu1 }
 0x1cb   :  { %v788_v26 = vadd.f32 %v787_v22, %v746_v41  ;;  %v1075_v11 = vpop.f32.mrf.mxu0 }
 0x1cd   :  { %2041 = vmatmul.msk.f32.gmra.mxu1 %vm662_vm1, %v3618_v45  ;;  %v858_v57 = vadd.f32 %v4002_v61, %v788_v26 }
 0x1ce   :  { %2052 = vmatmul.msk.f32.vlgmr.msra.gmra.mxu2 %vm662_vm1, %v3676_v47 }
 0x1d0   :  { %v910_v38 = vpop.f32.mrf.mxu2 }
 0x1d1   :  { %v922_v10 = vadd.f32 %v910_v38, %v857_v35  ;;  %v1043_v24 = vpop.f32.mrf.mxu3 }
 0x1d2   :  { %v1073_v59 = vadd.f32 %v1072_v31, %v1043_v24  ;;  %v749_v2 = vpop.f32.mrf.mxu1 }
 0x1d3   :  { %v791_v33 = vadd.f32 %v790_v63, %v749_v2  ;;  %v2065_v2 = vld [vmem:[%s4323_s5 + $0x98] sm:$0xff] }
 0x1d4   :  { %1613 = vmatpush.msrb.mxu1 %v2065_v2  ;;  %v2071_v2 = vld [vmem:[%s4323_s5 + $0xb8] sm:$0xff] }
 0x1d5   :  { %2042 = vmatmul.msk.f32.gmra.mxu1 %vm662_vm1, %v3676_v47  ;;  %v859_v32 = vadd.f32 %v851_v23, %v791_v33  ;;  %v1078_v47 = vpop.f32.mrf.mxu0  ;;  %v2064_v33 = vld [vmem:[%s4323_s5 + $0x90] sm:$0xff] }
 0x1d6   :  { %2053 = vmatmul.msk.f32.gmra.mxu2 %vm662_vm1, %v3719_v29  ;;  %1614 = vmatpush.msrb.mxu1 %v2064_v33  ;;  %v2086_v33 = vld [vmem:[%s4323_s5 + $0x128] sm:$0xff] }
 0x1d8   :  { %v913_v45 = vpop.f32.mrf.mxu2 }
 0x1d9   :  { %v923_v20 = vadd.f32 %v913_v45, %v858_v57  ;;  %v1046_v28 = vpop.f32.mrf.mxu3 }
 0x1da   :  { %v1076_v16 = vadd.f32 %v1075_v11, %v1046_v28  ;;  %v752_v53 = vpop.f32.mrf.mxu1  ;;  %v2063_v11 = vld [vmem:[%s4323_s5 + $0x88] sm:$0xff]  ;;  %v1590_v28 = vld [vmem:[%s4323_s5 + $0x40] sm:$0xff] }
 0x1db   :  { %v794_v43 = vadd.f32 %v793_v39, %v752_v53  ;;  %1615 = vmatpush.msrb.mxu1 %v2063_v11 }
 0x1dd   :  { %2043 = vmatmul.msk.f32.gmra.mxu1 %vm662_vm1, %v3719_v29  ;;  %v860_v13 = vadd.f32 %v854_v30, %v794_v43  ;;  %v4095_v22 = vpop.f32.mrf.mxu0 }
 0x1de   :  { %2054 = vmatmul.msk.f32.gmra.mxu2 %vm662_vm1, %v3758_v51 }
 0x1e0   :  { %v916_v17 = vpop.f32.mrf.mxu2 }
 0x1e1   :  { %v924_v9 = vadd.f32 %v916_v17, %v859_v32  ;;  %v1049_v3 = vpop.f32.mrf.mxu3  ;;  %v1591_v32 = vld [vmem:[%s4323_s5 + $0x48] sm:$0xff]  ;;  %v2061_v17 = vld [vmem:[%s4323_s5 + $0x78] sm:$0xff] }
 0x1e2   :  { %v1079_v56 = vadd.f32 %v1078_v47, %v1049_v3  ;;  %v975_v54 = vpop.f32.mrf.mxu1  ;;  %1636 = vmatpush.msrb.mxu3 %v1591_v32  ;;  %v1588_v47 = vld [vmem:[%s4323_s5 + $0x30] sm:$0xff]  ;;  %v1587_v3 = vld [vmem:[%s4323_s5 + $0x28] sm:$0xff] }
 0x1e3   :  { %v4087_v6 = vadd.f32 %v975_v54, %v922_v10 }
 0x1e4   :  { %1637 = vmatpush.msrb.mxu3 %v1590_v28  ;;  %v2070_v28 = vld [vmem:[%s4323_s5 + $0xb0] sm:$0xff] }
 0x1e5   :  { %v4099_v25 = vpop.f32.mrf.mxu0 }
 0x1e6   :  { %2055 = vmatmul.msk.f32.gmra.mxu2 %vm662_vm1, %v3955_v27 }
 0x1e8   :  { %v919_v61 = vpop.f32.mrf.mxu2 }
 0x1e9   :  { %v925_v37 = vadd.f32 %v919_v61, %v860_v13  ;;  %v1212_v7 = vpop.f32.mrf.mxu3  ;;  %v1589_v13 = vld [vmem:[%s4323_s5 + $0x38] sm:$0xff] }
 0x1ea   :  { %v978_v18 = vpop.f32.mrf.mxu1  ;;  %1638 = vmatpush.msrb.mxu3 %v1589_v13 }
 0x1eb   :  { %v4091_v60 = vadd.f32 %v978_v18, %v923_v20  ;;  %v2058_v18 = vld [vmem:[%s4323_s5 + $0x60] sm:$0xff] }
 0x1ec   :  { %1639 = vmatpush.msrb.mxu3 %v1588_v47 }
 0x1ed   :  { %v4105_v15 = vpop.f32.mrf.mxu0 }
 0x1ee   :  { %1640 = vmatpush.msrb.mxu3 %v1587_v3  ;;  %v2068_v3 = vld [vmem:[%s4323_s5 + $0xa0] sm:$0xff] }
 0x1f0   :  { %v1114_v29 = vpop.f32.mrf.mxu2 }
 0x1f1   :  { %v1126_v58 = vadd.f32 %v1114_v29, %v1070_v4  ;;  %v1215_v50 = vpop.f32.mrf.mxu3 }
 0x1f2   :  { %v981_v51 = vpop.f32.mrf.mxu1 }
 0x1f3   :  { %v4093_v12 = vadd.f32 %v981_v51, %v924_v9  ;;  %v2060_v9 = vld [vmem:[%s4323_s5 + $0x70] sm:$0xff]  ;;  %v2057_v51 = vld [vmem:[%s4323_s5 + $0x58] sm:$0xff] }
 0x1f5   :  { %v4115_v55 = vpop.f32.mrf.mxu0 }
 0x1f8   :  { %v1117_v23 = vpop.f32.mrf.mxu2 }
 0x1f9   :  { %v1127_v46 = vadd.f32 %v1117_v23, %v1073_v59  ;;  %v1218_v21 = vpop.f32.mrf.mxu3  ;;  %v1584_v23 = vld [vmem:[%s4323_s5 + $0x10] sm:$0xff] }
 0x1fa   :  { %v984_v42 = vpop.f32.mrf.mxu1 }
 0x1fb   :  { %v4097_v34 = vadd.f32 %v984_v42, %v925_v37  ;;  %v1586_v37 = vld [vmem:[%s4323_s5 + $0x20] sm:$0xff]  ;;  %v1583_v42 = vld [vmem:[%s4323_s5 + $0x8] sm:$0xff] }
 0x1fc   :  { %1641 = vmatpush.msrb.mxu3 %v1586_v37 }
 0x1fd   :  { %v4127_v10 = vpop.f32.mrf.mxu0 }
 0x200   :  { %v1120_v27 = vpop.f32.mrf.mxu2 }
 0x201   :  { %v1128_v49 = vadd.f32 %v1120_v27, %v1076_v16  ;;  %v1221_v62 = vpop.f32.mrf.mxu3  ;;  %v2062_v16 = vld [vmem:[%s4323_s5 + $0x80] sm:$0xff] }
 0x202   :  { %v1163_v63 = vpop.f32.mrf.mxu1  ;;  %1616 = vmatpush.msrb.mxu1 %v2062_v16  ;;  %v2085_v16 = vld [vmem:[%s4323_s5 + $0x120] sm:$0xff] }
 0x203   :  { %v1175_v19 = vadd.f32 %v1163_v63, %v1126_v58  ;;  %v1585_v58 = vld [vmem:[%s4323_s5 + $0x18] sm:$0xff]  ;;  %v2076_v63 = vld [vmem:[%s4323_s5 + $0xe0] sm:$0xff] }
 0x204   :  { %1617 = vmatpush.msrb.mxu1 %v2061_v17  ;;  %1642 = vmatpush.msrb.mxu3 %v1585_v58  ;;  %v2069_v17 = vld [vmem:[%s4323_s5 + $0xa8] sm:$0xff] }
 0x205   :  { %v4101_v36 = vadd.f32 %v1212_v7, %v1175_v19  ;;  %v4155_v53 = vpop.f32.mrf.mxu0 }
 0x206   :  { %1618 = vmatpush.msrb.mxu1 %v2060_v9  ;;  %1643 = vmatpush.msrb.mxu3 %v1584_v23 }
 0x207   :  { %v1228_v30 = vmax.f32 %v4087_v6, %v4101_v36 }
 0x208   :  { %v1123_v48 = vpop.f32.mrf.mxu2  ;;  %1644 = vmatpush.msrb.mxu3 %v1583_v42  ;;  %v2080_v42 = vld [vmem:[%s4323_s5 + $0xf8] sm:$0xff] }
 0x209   :  { %v1129_v52 = vadd.f32 %v1123_v48, %v1079_v56  ;;  %v4121_v31 = vpop.f32.mrf.mxu3  ;;  %v2059_v56 = vld [vmem:[%s4323_s5 + $0x68] sm:$0xff]  ;;  %v2075_v48 = vld [vmem:[%s4323_s5 + $0xd8] sm:$0xff] }
 0x20a   :  { %v1166_v1 = vpop.f32.mrf.mxu1  ;;  %1619 = vmatpush.msrb.mxu1 %v2059_v56 }
 0x20b   :  { %v1176_v14 = vadd.f32 %v1166_v1, %v1127_v46  ;;  %v2056_v46 = vld [vmem:[%s4323_s5 + $0x50] sm:$0xff] }
 0x20c   :  { %1620 = vmatpush.msrb.mxu1 %v2058_v18 }
 0x20d   :  { %v4107_v39 = vadd.f32 %v1215_v50, %v1176_v14  ;;  %v4193_v7 = vpop.f32.mrf.mxu0  ;;  %v2077_v50 = vld [vmem:[%s4323_s5 + $0xe8] sm:$0xff] }
 0x20e   :  { %1621 = vmatpush.msrb.mxu1 %v2057_v51  ;;  %v2073_v14 = vld [vmem:[%s4323_s5 + $0xc8] sm:$0xff]  ;;  %v2081_v51 = vld [vmem:[%s4323_s5 + $0x100] sm:$0xff] }
 0x20f   :  { %v1229_v0 = vmax.f32 %v4091_v60, %v4107_v39 }
 0x210   :  { %v4111_v44 = vpop.f32.mrf.mxu2  ;;  %1622 = vmatpush.msrb.mxu1 %v2056_v46 }
 0x211   :  { %v4145_v45 = vpop.f32.mrf.mxu3  ;;  %v1279_v32 = vadd.f32 %v4111_v44, %v4095_v22  ;;  %v2084_v22 = vld [vmem:[%s4323_s5 + $0x118] sm:$0xff] }
 0x212   :  { %v1169_v8 = vpop.f32.mrf.mxu1  ;;  %1670 = vmatpush.msra.mxu1 %v2077_v50 }
 0x213   :  { %v1177_v40 = vadd.f32 %v1169_v8, %v1128_v49  ;;  %v1582_v49 = vld [vmem:[%s4323_s5] sm:$0xff] }
 0x214   :  { %1645 = vmatpush.msrb.mxu3 %v1582_v49  ;;  %1671 = vmatpush.msra.mxu1 %v2076_v63 }
 0x215   :  { %v4113_v35 = vadd.f32 %v1218_v21, %v1177_v40  ;;  %v4223_v1 = vpop.f32.mrf.mxu0  ;;  %v2072_v40 = vld [vmem:[%s4323_s5 + $0xc0] sm:$0xff] }
 0x216   :  { %1672 = vmatpush.msra.mxu1 %v2075_v48  ;;  %v2091_v48 = vld [vmem:[%s4322_s4] ss:$0 sm:$0xff] }
 0x217   :  { %v1230_v5 = vmax.f32 %v4093_v12, %v4113_v35 }
 0x218   :  { %v4119_v4 = vpop.f32.mrf.mxu2 }
 0x219   :  { %v4177_v54 = vpop.f32.mrf.mxu3  ;;  %v1282_v18 = vadd.f32 %v4119_v4, %v4099_v25  ;;  %v2079_v25 = vld [vmem:[%s4323_s5 + $0xf0] sm:$0xff] }
 0x21a   :  { %v1172_v41 = vpop.f32.mrf.mxu1 }
 0x21b   :  { %v1178_v26 = vadd.f32 %v1172_v41, %v1129_v52  ;;  %v2074_v52 = vld [vmem:[%s4323_s5 + $0xd0] sm:$0xff] }
 0x21c   :  { %1673 = vmatpush.msra.mxu1 %v2074_v52  ;;  %v2087_v41 = vld [vmem:[%s4323_s5 + $0x130] sm:$0xff] }
 0x21d   :  { %v4123_v57 = vadd.f32 %v1221_v62, %v1178_v26  ;;  %v2088_v62 = vld [vmem:[%s4323_s5 + $0x138] sm:$0xff]  ;;  %v1517_v47 = vpop.f32.mrf.mxu0 }
 0x21e   :  { %1674 = vmatpush.msra.mxu1 %v2073_v14  ;;  %1705 = vmatpush.msra.mxu3 %v2088_v62 }
 0x21f   :  { %v1231_v38 = vmax.f32 %v4097_v34, %v4123_v57 }
 0x220   :  { %v4129_v24 = vpop.f32.mrf.mxu2  ;;  %1675 = vmatpush.msra.mxu1 %v2072_v40  ;;  %1706 = vmatpush.msra.mxu3 %v2087_v41 }
 0x221   :  { %v4213_v19 = vpop.f32.mrf.mxu3  ;;  %v1285_v14 = vadd.f32 %v4129_v24, %v4105_v15 }
 0x222   :  { %v4131_v59 = vpop.f32.mrf.mxu1  ;;  %1676 = vmatpush.msra.mxu1 %v2071_v2  ;;  %1707 = vmatpush.msra.mxu3 %v2086_v33 }
 0x223   :  { %v1319_v13 = vadd.f32 %v4131_v59, %v1279_v32  ;;  %v2083_v59 = vld [vmem:[%s4323_s5 + $0x110] sm:$0xff] }
 0x224   :  { %1677 = vmatpush.msra.mxu1 %v2070_v28  ;;  %1708 = vmatpush.msra.mxu3 %v2085_v16 }
 0x225   :  { %v1352_v56 = vadd.f32 %v4121_v31, %v1319_v13 }
 0x226   :  { %1678 = vmatpush.msra.mxu1 %v2069_v17  ;;  %1709 = vmatpush.msra.mxu3 %v2084_v22 }
 0x227   :  { %v1401_v23 = vadd.f32 %v4127_v10, %v1352_v56 }
 0x228   :  { %1679 = vmatpush.msra.mxu1 %v2068_v3  ;;  %1710 = vmatpush.msra.mxu3 %v2083_v59 }
 0x229   :  { %v4147_v20 = vpop.f32.mrf.mxu2  ;;  %v1484_v11 = vpop.f32.mrf.mxu3  ;;  %v1405_v10 = vmax.f32 %v1228_v30, %v1401_v23 }
 0x22a   :  { %v4157_v43 = vpop.f32.mrf.mxu1  ;;  %v1288_v24 = vadd.f32 %v4147_v20, %v4115_v55 }
 0x22b   :  { %v1320_v31 = vadd.f32 %v4157_v43, %v1282_v18 }
 0x22d   :  { %v1353_v63 = vadd.f32 %v4145_v45, %v1320_v31  ;;  %v2092_v31 = vld [vmem:[%s4324_s6] ss:$0 sm:$0xff] }
 0x22f   :  { %v1402_v41 = vadd.f32 %v4155_v53, %v1353_v63 }
 0x231   :  { %v1426_v61 = vpop.f32.mrf.mxu2  ;;  %v1487_v46 = vpop.f32.mrf.mxu3 }
 0x232   :  { %v4185_v29 = vpop.f32.mrf.mxu1 }
 0x233   :  { %v1321_v45 = vadd.f32 %v4185_v29, %v1285_v14 }
 0x235   :  { %v1354_v32 = vadd.f32 %v4177_v54, %v1321_v45 }
 0x239   :  { %v1429_v27 = vpop.f32.mrf.mxu2  ;;  %v1490_v2 = vpop.f32.mrf.mxu3 }
 0x23a   :  { %v4215_v21 = vpop.f32.mrf.mxu1 }
 0x23b   :  { %v1322_v13 = vadd.f32 %v4215_v21, %v1288_v24 }
 0x23d   :  { %v1355_v39 = vadd.f32 %v4213_v19, %v1322_v13 }
 0x241   :  { %v1432_v8 = vpop.f32.mrf.mxu2  ;;  %v1493_v20 = vpop.f32.mrf.mxu3 }
 0x242   :  { %v1455_v26 = vpop.f32.mrf.mxu1 }
 0x243   :  { %v1456_v44 = vadd.f32 %v1455_v26, %v1426_v61  ;;  %v2082_v61 = vld [vmem:[%s4323_s5 + $0x108] sm:$0xff] }
 0x244   :  { %1711 = vmatpush.msra.mxu3 %v2082_v61 }
 0x245   :  { %v1496_v58 = vadd.f32 %v1484_v11, %v1456_v44  ;;  %v1406_v11 = vmax.f32 %v1229_v0, %v1402_v41 }
 0x246   :  { %1712 = vmatpush.msra.mxu3 %v2081_v51 }
 0x247   :  { %v1529_v49 = vadd.f32 %v1517_v47, %v1496_v58 }
 0x248   :  { %1713 = vmatpush.msra.mxu3 %v2080_v42 }
 0x249   :  { %v1435_v9 = vpop.f32.mrf.mxu2 }
 0x24a   :  { %v1458_v37 = vpop.f32.mrf.mxu1  ;;  %1714 = vmatpush.msra.mxu3 %v2079_v25 }
 0x24b   :  { %v1459_v50 = vadd.f32 %v1458_v37, %v1429_v27  ;;  %v1520_v27 = vpop.f32.mrf.mxu0 }
 0x24d   :  { %v1497_v62 = vadd.f32 %v1487_v46, %v1459_v50 }
 0x24f   :  { %v1530_v30 = vadd.f32 %v1520_v27, %v1497_v62 }
 0x251   :  { %v1550_v4 = vpop.f32.mrf.mxu2 }
 0x252   :  { %v1562_v43 = vadd.f32 %v1550_v4, %v1529_v49  ;;  %v1461_v52 = vpop.f32.mrf.mxu1 }
 0x253   :  { %v1462_v36 = vadd.f32 %v1461_v52, %v1432_v8  ;;  %v1523_v28 = vpop.f32.mrf.mxu0  ;;  %v1403_v8 = vadd.f32 %v4193_v7, %v1354_v32  ;;  %v1404_v7 = vadd.f32 %v4223_v1, %v1355_v39 }
 0x254   :  { %v1566_v40 = vmax.f32 %v1405_v10, %v1562_v43 }
 0x255   :  { %v1498_v53 = vadd.f32 %v1490_v2, %v1462_v36  ;;  %v1407_v0 = vmax.f32 %v1230_v5, %v1403_v8  ;;  %v1408_v19 = vmax.f32 %v1231_v38, %v1404_v7 }
 0x256   :  { %v1574_v26 = vadd.f32 %v2091_v48, %v1566_v40 }
 0x257   :  { %v1531_v44 = vadd.f32 %v1523_v28, %v1498_v53 }
 0x258   :  { %v1578_v6 = vmax.f32 %v1574_v26, 0.0 }
 0x259   :  { %v1553_v33 = vpop.f32.mrf.mxu2 }
 0x25a   :  { %v1563_v15 = vadd.f32 %v1553_v33, %v1530_v30  ;;  %2067 = vmatmul.msk.f32.vlgmr.msrb.gmra.mxu3 %vm1603_vm2, %v1578_v6  ;;  %v1464_v16 = vpop.f32.mrf.mxu1 }
 0x25b   :  { %v1465_v22 = vadd.f32 %v1464_v16, %v1435_v9  ;;  %v1526_v59 = vpop.f32.mrf.mxu0 }
 0x25c   :  { %v1567_v29 = vmax.f32 %v1406_v11, %v1563_v15 }
 0x25d   :  { %v1499_v47 = vadd.f32 %v1493_v20, %v1465_v22 }
 0x25e   :  { %v1575_v17 = vadd.f32 %v2091_v48, %v1567_v29 }
 0x25f   :  { %v1532_v9 = vadd.f32 %v1526_v59, %v1499_v47 }
 0x260   :  { %v1579_v54 = vmax.f32 %v1575_v17, 0.0 }
 0x261   :  { %v1556_v60 = vpop.f32.mrf.mxu2 }
 0x262   :  { %v1564_v55 = vadd.f32 %v1556_v60, %v1531_v44  ;;  %2066 = vmatmul.msk.f32.vlgmr.msrb.gmra.mxu1 %vm1603_vm2, %v1579_v54 }
 0x264   :  { %v1568_v3 = vmax.f32 %v1407_v0, %v1564_v55 }
 0x266   :  { %v1576_v21 = vadd.f32 %v2091_v48, %v1568_v3 }
 0x268   :  { %v1580_v56 = vmax.f32 %v1576_v21, 0.0 }
 0x269   :  { %v1559_v37 = vpop.f32.mrf.mxu2 }
 0x26a   :  { %v1565_v61 = vadd.f32 %v1559_v37, %v1532_v9  ;;  %2078 = vmatmul.msk.f32.vlgmr.msra.gmra.mxu1 %vm1603_vm2, %v1580_v56 }
 0x26c   :  { %v1569_v12 = vmax.f32 %v1408_v19, %v1565_v61 }
 0x26e   :  { %v1577_v35 = vadd.f32 %v2091_v48, %v1569_v12 }
 0x270   :  { %v1581_v5 = vmax.f32 %v1577_v35, 0.0 }
 0x272   :  { %2089 = vmatmul.msk.f32.vlgmr.msra.gmra.mxu3 %vm1603_vm2, %v1581_v5 }
 0x2dd   :  { %v1647_v58 = vpop.f32.mrf.mxu3 }
 0x2df   :  { %v1624_v18 = vpop.f32.mrf.mxu1 }
 0x2e0   :  { %v1648_v51 = vadd.f32 %v1647_v58, %v1624_v18 }
 0x2e7   :  { %v1681_v1 = vpop.f32.mrf.mxu1 }
 0x2e8   :  { %v1684_v23 = vadd.f32 %v1681_v1, %v1648_v51 }
 0x2f5   :  { %v1716_v46 = vpop.f32.mrf.mxu3 }
 0x2f6   :  { %v1719_v34 = vadd.f32 %v1716_v46, %v1684_v23 }
 0x2f8   :  { %v1724_v57 = vadd.f32 %v2092_v31, %v1719_v34 }
 0x2fa   :  { %1725 = vst [vmem:[%s4325_s7] sm:$0xff] %v1724_v57 }

</bundles_post_ra>
